<compile_context>
chip_gen: v7x
topology: tpu7x:2x2x1
jax: 0.10.0
libtpu: 0.0.40
codegen_flags: <defaults>
</compile_context>

<pallas_src>
from functools import partial

import numpy as np
import jax
import jax.numpy as jnp
from jax import lax
from jax.experimental import pallas as pl
from jax.experimental.pallas import tpu as pltpu

_LN_EPS = 1e-5
_INV_SQRT2 = 0.7071067811865476


def _vmem_capacity_bytes():
    """Physical VMEM capacity; falls back to 64 MiB (v7x-safe) if unknown."""
    try:
        info = pltpu.get_tpu_info()
        cap = getattr(info, "vmem_capacity_bytes", None)
        if cap:
            return int(cap)
    except Exception:
        pass
    return 64 << 20


# ----------------------------------------------------------------------------
# Pallas kernel: fuse_fn = MLP1(no res) + prompt-res, MLP2(res), final LN
# ----------------------------------------------------------------------------
def _make_fuse_kernel(Np, D, TN, NBUF):
    NT = D // TN          # column tiles per [*, D] weight
    T = 5 * NT            # total weight tiles in the flat streaming sequence
    PD = min(NBUF - 1, T)  # DMAs kept in flight

    def kernel(p_ref, id_ref,
               ln1w_p, ln1b_p, ln1w_i, ln1b_i,
               b1_ref, b2_ref, ln2w_ref, ln2b_ref, b3_ref, b4_ref,
               lnfw_ref, lnfb_ref,
               w_hbm,
               out_ref,
               wbuf, dma_sem, lhs0, lhs1, h_s, x1_s):
        f32 = jnp.float32
        bf16 = jnp.bfloat16

        def layernorm(v, w_r, b_r):
            mu = jnp.mean(v, axis=-1, keepdims=True)
            var = jnp.mean((v - mu) ** 2, axis=-1, keepdims=True)
            return (v - mu) * lax.rsqrt(var + _LN_EPS) * w_r[...] + b_r[...]

        def gelu(v):  # exact (erf) GELU == nn.GELU() default
            return 0.5 * v * (1.0 + lax.erf(v * _INV_SQRT2))

        def tile_copy(t, slot):
            return pltpu.make_async_copy(w_hbm.at[t], wbuf.at[slot],
                                         dma_sem.at[slot])

        def consume(t):
            # Keep the chain full: start tile t+PD before waiting on tile t.
            nxt = t + PD
            if nxt < T:
                tile_copy(nxt, nxt % NBUF).start()
            slot = t % NBUF
            tile_copy(t, slot).wait()
            return slot

        # Prime the weight-DMA chain BEFORE any compute so the joint LayerNorm
        # is hidden behind the first weight transfers.
        for t in range(PD):
            tile_copy(t, t % NBUF).start()

        # --- joint LayerNorm over concat([prompt, id], -1), never built as
        # --- a [Np, 2D] tensor; normalized halves land in lhs0 / lhs1 (bf16)
        p32 = p_ref[...].astype(f32)
        id32 = id_ref[...].astype(f32)
        inv_width = 1.0 / (2 * D)
        mu = (jnp.sum(p32, axis=-1, keepdims=True)
              + jnp.sum(id32, axis=-1, keepdims=True)) * inv_width
        pc = p32 - mu
        ic = id32 - mu
        var = (jnp.sum(pc * pc, axis=-1, keepdims=True)
               + jnp.sum(ic * ic, axis=-1, keepdims=True)) * inv_width
        inv = lax.rsqrt(var + _LN_EPS)
        lhs0[...] = (pc * inv * ln1w_p[...] + ln1b_p[...]).astype(bf16)
        lhs1[...] = (ic * inv * ln1w_i[...] + ln1b_i[...]).astype(bf16)

        # --- pass 0: mlp1.fc1  ([LNp, LNid] @ [W1p; W1i]); halves fused into
        # --- one tile loop with register accumulation, single h_s store.
        for j in range(NT):
            s = consume(2 * j)          # prompt-half column tile j
            acc = jnp.dot(lhs0[...], wbuf[s], preferred_element_type=f32)
            s = consume(2 * j + 1)      # id-half column tile j
            acc = acc + jnp.dot(lhs1[...], wbuf[s], preferred_element_type=f32)
            h_s[:, j * TN:(j + 1) * TN] = acc

        def run_pass(m, lhs_ref):       # passes 1..3 over [D, D] weights
            base = (m + 1) * NT
            for j in range(NT):
                s = consume(base + j)
                h_s[:, j * TN:(j + 1) * TN] = jnp.dot(
                    lhs_ref[...], wbuf[s], preferred_element_type=f32)

        # epilogue 0 (overlapped with pass-1 weight DMAs already in flight)
        lhs0[...] = gelu(h_s[...] + b1_ref[...]).astype(bf16)

        # --- pass 1: mlp1.fc2 (no residual) + prompt residual from fuse_fn
        run_pass(1, lhs0)
        x1_s[...] = h_s[...] + b2_ref[...] + p_ref[...].astype(f32)
        lhs0[...] = layernorm(x1_s[...], ln2w_ref, ln2b_ref).astype(bf16)

        # --- pass 2: mlp2.fc1
        run_pass(2, lhs0)
        lhs0[...] = gelu(h_s[...] + b3_ref[...]).astype(bf16)

        # --- pass 3: mlp2.fc2 + residual, then final layer_norm
        run_pass(3, lhs0)
        x2 = h_s[...] + b4_ref[...] + x1_s[...]
        out_ref[...] = layernorm(x2, lnfw_ref, lnfb_ref).astype(out_ref.dtype)

    return kernel


def fuse_fn_pallas(image_token_embeds, valid_id_embeds, params, *,
                   tile_n=None, num_weight_buffers=3):
    (ln1_w, ln1_b, w1, b1, w2, b2,
     ln2_w, ln2_b, w3, b3, w4, b4, lnf_w, lnf_b) = params

    N, D = image_token_embeds.shape
    assert valid_id_embeds.shape == (N, D)
    assert D % 128 == 0, "feature dim must be a multiple of 128 (lane-dense)"
    NBUF = int(num_weight_buffers)
    assert NBUF >= 2

    vmem_cap = _vmem_capacity_bytes()
    if tile_n is None:
        # Weight ring-buffer budget: ~1/3 of physical VMEM (bigger tiles on
        # 128 MiB v5e/v6e, capped plan on 64 MiB v7x).
        budget = max(vmem_cap // 3, 8 << 20)
        tile_n = 128
        for cand in (2048, 1024, 512, 256, 128):
            if cand <= D and D % cand == 0 and NBUF * D * cand * 2 <= budget:
                tile_n = cand
                break
    assert D % tile_n == 0 and tile_n % 128 == 0
    NT = D // tile_n

    # Pad rows to a multiple of 16 (bf16 sublane packing); sliced off at the end.
    n_pad = (-N) % 16
    Np = N + n_pad
    p = jnp.pad(image_token_embeds, ((0, n_pad), (0, 0))) if n_pad else image_token_embeds
    idv = jnp.pad(valid_id_embeds, ((0, n_pad), (0, 0))) if n_pad else valid_id_embeds

    f32, bf16 = jnp.float32, jnp.bfloat16
    row = lambda v: jnp.asarray(v, f32).reshape(1, -1)

    ln1_w = jnp.asarray(ln1_w, f32).reshape(-1)
    ln1_b = jnp.asarray(ln1_b, f32).reshape(-1)

    # --- pre-pack all weights into one tile-major contiguous HBM slab --------
    def pack_cols(w):  # [K, D] -> [NT, K, TN] (each tile contiguous)
        w = jnp.asarray(w, bf16)
        K = w.shape[0]
        return jnp.transpose(w.reshape(K, NT, tile_n), (1, 0, 2))

    w1 = jnp.asarray(w1, bf16)                       # [2D, D]
    w1p, w1i = pack_cols(w1[:D]), pack_cols(w1[D:])  # prompt / id input halves
    w1_inter = jnp.stack([w1p, w1i], axis=1).reshape(2 * NT, D, tile_n)
    w_all = jnp.concatenate(
        [w1_inter, pack_cols(w2), pack_cols(w3), pack_cols(w4)],
        axis=0)                                      # [5*NT, D, TN]

    vmem_args = (
        p, idv,
        ln1_w[:D].reshape(1, D), ln1_b[:D].reshape(1, D),
        ln1_w[D:].reshape(1, D), ln1_b[D:].reshape(1, D),
        row(b1), row(b2), row(ln2_w), row(ln2_b),
        row(b3), row(b4), row(lnf_w), row(lnf_b),
    )
    hbm_args = (w_all,)

    itemsize = np.dtype(image_token_embeds.dtype).itemsize
    working = (
        3 * Np * D * itemsize          # prompt / id inputs + output
        + NBUF * D * tile_n * 2        # weight-tile ring buffer (bf16)
        + 2 * Np * D * 2               # bf16 matmul-LHS staging (lhs0/lhs1)
        + 2 * Np * D * 4               # f32 hidden / residual scratch
        + 16 * D * 4                   # LayerNorm / bias vectors
    )
    vmem_limit = int(min(max(working + (16 << 20), 32 << 20),
                         vmem_cap - (4 << 20)))
    vmem_limit = max(vmem_limit, working + (2 << 20))
    compiler_params = pltpu.CompilerParams(vmem_limit_bytes=vmem_limit)

    cost = pl.CostEstimate(
        flops=10 * Np * D * D,                        # five [Np,D]x[D,D] passes
        transcendentals=2 * Np * D,                   # two erf-GELUs
        bytes_accessed=10 * D * D + 3 * Np * D * itemsize,
    )

    out = pl.pallas_call(
        _make_fuse_kernel(Np, D, tile_n, NBUF),
        out_shape=jax.ShapeDtypeStruct((Np, D), image_token_embeds.dtype),
        in_specs=(
            [pl.BlockSpec(memory_space=pltpu.MemorySpace.VMEM)] * len(vmem_args)
            + [pl.BlockSpec(memory_space=pl.ANY)] * len(hbm_args)),
        out_specs=pl.BlockSpec(memory_space=pltpu.MemorySpace.VMEM),
        scratch_shapes=[
            pltpu.VMEM((NBUF, D, tile_n), bf16),   # weight-tile ring buffer
            pltpu.SemaphoreType.DMA((NBUF,)),
            pltpu.VMEM((Np, D), bf16),             # lhs0 (prompt-half / later LHS)
            pltpu.VMEM((Np, D), bf16),             # lhs1 (id-half for fc1)
            pltpu.VMEM((Np, D), f32),              # h_s  (matmul output)
            pltpu.VMEM((Np, D), f32),              # x1_s (mlp2 residual)
        ],
        compiler_params=compiler_params,
        cost_estimate=cost,
    )(*(vmem_args + hbm_args))

    return out[:N] if n_pad else out


# ----------------------------------------------------------------------------
# Pure-JAX reference with the same numerics (bf16 weights, f32 accumulation)
# ----------------------------------------------------------------------------
def fuse_fn_ref(p, idv, params):
    (ln1_w, ln1_b, w1, b1, w2, b2,
     ln2_w, ln2_b, w3, b3, w4, b4, lnf_w, lnf_b) = params
    f32, bf16 = jnp.float32, jnp.bfloat16

    def ln(v, w, b):
        mu = jnp.mean(v, axis=-1, keepdims=True)
        var = jnp.mean((v - mu) ** 2, axis=-1, keepdims=True)
        return (v - mu) * lax.rsqrt(var + _LN_EPS) * w + b

    def gelu(v):
        return 0.5 * v * (1.0 + lax.erf(v * _INV_SQRT2))

    def mm(x, w):
        return jnp.dot(x.astype(bf16), w, preferred_element_type=f32)

    x = jnp.concatenate([p, idv], axis=-1).astype(f32)
    h = mm(ln(x, ln1_w, ln1_b), w1) + b1
    h = mm(gelu(h), w2) + b2
    x1 = h + p.astype(f32)
    h = mm(ln(x1, ln2_w, ln2_b), w3) + b3
    h = mm(gelu(h), w4) + b4
    x2 = h + x1
    return ln(x2, lnf_w, lnf_b).astype(p.dtype)


# ----------------------------------------------------------------------------
# FuseModule.forward glue (static mask -> static gather/scatter indices)
# ----------------------------------------------------------------------------
# TODO(synk): the boolean masked gather / masked_scatter_ is data-dependent and
# has no clean Pallas equivalent; it is resolved at trace time from a static
# numpy class_tokens_mask.
def fuse_module_forward(prompt_embeds, id_embeds, class_tokens_mask_np, params,
                        fuse_impl=fuse_fn_pallas):
    id_embeds = id_embeds.astype(prompt_embeds.dtype)
    batch_size, max_num_inputs = id_embeds.shape[:2]
    seq_length = prompt_embeds.shape[1]
    mask = np.asarray(class_tokens_mask_np, dtype=bool)

    # Per-batch trigger counts: identical to the PyTorch module for B == 1 (the
    # only case its flat boolean indexing supports) and correct per-row for B>1.
    num_inputs = mask.sum(axis=1)
    valid_id_mask = np.arange(max_num_inputs)[None, :] < num_inputs[:, None]
    valid_idx = np.nonzero(valid_id_mask.reshape(-1))[0]

    flat_id = id_embeds.reshape(-1, id_embeds.shape[-2], id_embeds.shape[-1])
    valid_id_embeds = flat_id[valid_idx].reshape(-1, flat_id.shape[-1])

    flat_prompt = prompt_embeds.reshape(-1, prompt_embeds.shape[-1])
    token_idx = np.nonzero(mask.reshape(-1))[0]
    image_token_embeds = flat_prompt[token_idx]

    stacked_id_embeds = fuse_impl(image_token_embeds, valid_id_embeds, params)
    assert int(mask.sum()) == stacked_id_embeds.shape[0], (
        f"{int(mask.sum())} != {stacked_id_embeds.shape[0]}")

    # masked_scatter_ equivalent
    flat_prompt = flat_prompt.at[token_idx].set(
        stacked_id_embeds.astype(flat_prompt.dtype))
    return flat_prompt.reshape(batch_size, seq_length, -1)


# ----------------------------------------------------------------------------
# Deterministic parameter init (shapes from FuseModule.__init__, bf16 weights)
# ----------------------------------------------------------------------------
def init_params(key, embed_dim):
    D = embed_dim
    ks = jax.random.split(key, 14)
    f32, bf16 = jnp.float32, jnp.bfloat16
    ws, bs = 0.05, 0.02
    return (
        # mlp1: LayerNorm(2D), Linear(2D -> D), Linear(D -> D)
        1.0 + bs * jax.random.normal(ks[0], (2 * D,), f32),
        bs * jax.random.normal(ks[1], (2 * D,), f32),
        (ws * jax.random.normal(ks[2], (2 * D, D), f32)).astype(bf16),
        bs * jax.random.normal(ks[3], (D,), f32),
        (ws * jax.random.normal(ks[4], (D, D), f32)).astype(bf16),
        bs * jax.random.normal(ks[5], (D,), f32),
        # mlp2: LayerNorm(D), Linear(D -> D), Linear(D -> D)
        1.0 + bs * jax.random.normal(ks[6], (D,), f32),
        bs * jax.random.normal(ks[7], (D,), f32),
        (ws * jax.random.normal(ks[8], (D, D), f32)).astype(bf16),
        bs * jax.random.normal(ks[9], (D,), f32),
        (ws * jax.random.normal(ks[10], (D, D), f32)).astype(bf16),
        bs * jax.random.normal(ks[11], (D,), f32),
        # final layer_norm(D)
        1.0 + bs * jax.random.normal(ks[12], (D,), f32),
        bs * jax.random.normal(ks[13], (D,), f32),
    )


if __name__ == "__main__":
    key = jax.random.PRNGKey(0)
    k0, k1, k2 = jax.random.split(key, 3)

    # small shapes consistent with the module (D lane-aligned to 128)
    B, S, D = 2, 16, 256
    max_num_inputs = 8

    prompt_embeds = jax.random.normal(k0, (B, S, D), jnp.float32)
    id_embeds = jax.random.normal(k1, (B, max_num_inputs, 1, D), jnp.float32)

    # static class-token mask: 5 + 3 trigger tokens across the two batch rows
    class_tokens_mask = np.zeros((B, S), dtype=bool)
    class_tokens_mask[0, [1, 3, 5, 8, 12]] = True
    class_tokens_mask[1, [2, 7, 9]] = True

    params = init_params(k2, D)

    ref = fuse_module_forward(prompt_embeds, id_embeds, class_tokens_mask,
                              params, fuse_impl=fuse_fn_ref)
    ref = jax.block_until_ready(ref)

    # default (VMEM-aware) weight-column tile — 256 for D=256, NT=1, 5 tiles
    out = fuse_module_forward(prompt_embeds, id_embeds, class_tokens_mask,
                              params, fuse_impl=fuse_fn_pallas)
    out = jax.block_until_ready(out)
    assert out.shape == (B, S, D)
    assert jnp.allclose(out, ref, atol=2e-2, rtol=2e-2), "mismatch vs reference"

    # tile_n=128 forces 2 column tiles per weight (10-tile stream) ->
    # exercises the rolling 3-deep-buffered HBM->VMEM prefetch chain
    out2 = fuse_module_forward(prompt_embeds, id_embeds, class_tokens_mask,
                               params,
                               fuse_impl=partial(fuse_fn_pallas, tile_n=128))
    out2 = jax.block_until_ready(out2)
    assert jnp.allclose(out2, ref, atol=2e-2, rtol=2e-2), "mismatch (tiled path)"

    print("KERNEL_OK")
</pallas_src>

<mosaic_0001>
module attributes {stable_mosaic.version = 11 : i64} {
  func.func @kernel(%arg0: memref<16x256xf32, #tpu.memory_space<vmem>>, %arg1: memref<16x256xf32, #tpu.memory_space<vmem>>, %arg2: memref<1x256xf32, #tpu.memory_space<vmem>>, %arg3: memref<1x256xf32, #tpu.memory_space<vmem>>, %arg4: memref<1x256xf32, #tpu.memory_space<vmem>>, %arg5: memref<1x256xf32, #tpu.memory_space<vmem>>, %arg6: memref<1x256xf32, #tpu.memory_space<vmem>>, %arg7: memref<1x256xf32, #tpu.memory_space<vmem>>, %arg8: memref<1x256xf32, #tpu.memory_space<vmem>>, %arg9: memref<1x256xf32, #tpu.memory_space<vmem>>, %arg10: memref<1x256xf32, #tpu.memory_space<vmem>>, %arg11: memref<1x256xf32, #tpu.memory_space<vmem>>, %arg12: memref<1x256xf32, #tpu.memory_space<vmem>>, %arg13: memref<1x256xf32, #tpu.memory_space<vmem>>, %arg14: memref<5x256x256xbf16, #tpu.memory_space<any>>, %arg15: memref<16x256xf32, #tpu.memory_space<vmem>>, %arg16: memref<3x256x256xbf16, #tpu.memory_space<vmem>>, %arg17: memref<3x!tpu.dma_semaphore, #tpu.memory_space<semaphore_mem>>, %arg18: memref<16x256xbf16, #tpu.memory_space<vmem>>, %arg19: memref<16x256xbf16, #tpu.memory_space<vmem>>, %arg20: memref<16x256xf32, #tpu.memory_space<vmem>>, %arg21: memref<16x256xf32, #tpu.memory_space<vmem>>) attributes {dimension_semantics = [], scalar_prefetch = 0 : i64, scratch_operands = 6 : i64, tpu.core_type = #tpu.core_type<tc>} {
    %c0_i32 = arith.constant 0 : i32
    %c0_i32_0 = arith.constant 0 : i32
    %c0_i32_1 = arith.constant 0 : i32
    %c0_i32_2 = arith.constant 0 : i32
    %c0_i32_3 = arith.constant 0 : i32
    %0 = tpu.memref_slice %arg14[%c0_i32, %c0_i32_2, %c0_i32_3] : memref<5x256x256xbf16, #tpu.memory_space<any>> -> memref<1x256x256xbf16, #tpu.memory_space<any>>
    %1 = tpu.memref_squeeze %0 : memref<1x256x256xbf16, #tpu.memory_space<any>> -> memref<256x256xbf16, #tpu.memory_space<any>>
    %c0_i32_4 = arith.constant 0 : i32
    %c0_i32_5 = arith.constant 0 : i32
    %2 = tpu.memref_slice %arg16[%c0_i32_0, %c0_i32_4, %c0_i32_5] : memref<3x256x256xbf16, #tpu.memory_space<vmem>> -> memref<1x256x256xbf16, #tpu.memory_space<vmem>>
    %3 = tpu.memref_squeeze %2 : memref<1x256x256xbf16, #tpu.memory_space<vmem>> -> memref<256x256xbf16, #tpu.memory_space<vmem>>
    %4 = tpu.memref_slice %arg17[%c0_i32_1] : memref<3x!tpu.dma_semaphore, #tpu.memory_space<semaphore_mem>> -> memref<1x!tpu.dma_semaphore, #tpu.memory_space<semaphore_mem>>
    %5 = tpu.memref_squeeze %4 : memref<1x!tpu.dma_semaphore, #tpu.memory_space<semaphore_mem>> -> memref<!tpu.dma_semaphore, #tpu.memory_space<semaphore_mem>>
    tpu.enqueue_dma source(%1 : memref<256x256xbf16, #tpu.memory_space<any>>) target(%3 : memref<256x256xbf16, #tpu.memory_space<vmem>>) target_semaphore(%5 : memref<!tpu.dma_semaphore, #tpu.memory_space<semaphore_mem>>)
    %c1_i32 = arith.constant 1 : i32
    %c1_i32_6 = arith.constant 1 : i32
    %c1_i32_7 = arith.constant 1 : i32
    %c0_i32_8 = arith.constant 0 : i32
    %c0_i32_9 = arith.constant 0 : i32
    %6 = tpu.memref_slice %arg14[%c1_i32, %c0_i32_8, %c0_i32_9] : memref<5x256x256xbf16, #tpu.memory_space<any>> -> memref<1x256x256xbf16, #tpu.memory_space<any>>
    %7 = tpu.memref_squeeze %6 : memref<1x256x256xbf16, #tpu.memory_space<any>> -> memref<256x256xbf16, #tpu.memory_space<any>>
    %c0_i32_10 = arith.constant 0 : i32
    %c0_i32_11 = arith.constant 0 : i32
    %8 = tpu.memref_slice %arg16[%c1_i32_6, %c0_i32_10, %c0_i32_11] : memref<3x256x256xbf16, #tpu.memory_space<vmem>> -> memref<1x256x256xbf16, #tpu.memory_space<vmem>>
    %9 = tpu.memref_squeeze %8 : memref<1x256x256xbf16, #tpu.memory_space<vmem>> -> memref<256x256xbf16, #tpu.memory_space<vmem>>
    %10 = tpu.memref_slice %arg17[%c1_i32_7] : memref<3x!tpu.dma_semaphore, #tpu.memory_space<semaphore_mem>> -> memref<1x!tpu.dma_semaphore, #tpu.memory_space<semaphore_mem>>
    %11 = tpu.memref_squeeze %10 : memref<1x!tpu.dma_semaphore, #tpu.memory_space<semaphore_mem>> -> memref<!tpu.dma_semaphore, #tpu.memory_space<semaphore_mem>>
    tpu.enqueue_dma source(%7 : memref<256x256xbf16, #tpu.memory_space<any>>) target(%9 : memref<256x256xbf16, #tpu.memory_space<vmem>>) target_semaphore(%11 : memref<!tpu.dma_semaphore, #tpu.memory_space<semaphore_mem>>)
    %c0 = arith.constant 0 : index
    %c0_12 = arith.constant 0 : index
    %12 = vector.load %arg0[%c0, %c0_12] : memref<16x256xf32, #tpu.memory_space<vmem>>, vector<16x256xf32>
    %c0_13 = arith.constant 0 : index
    %c0_14 = arith.constant 0 : index
    %13 = vector.load %arg1[%c0_13, %c0_14] : memref<16x256xf32, #tpu.memory_space<vmem>>, vector<16x256xf32>
    %cst = arith.constant dense<0.000000e+00> : vector<16xf32>
    %14 = vector.multi_reduction <add>, %12, %cst [1] : vector<16x256xf32> to vector<16xf32>
    %15 = vector.shape_cast %14 : vector<16xf32> to vector<16x1xf32>
    %cst_15 = arith.constant dense<0.000000e+00> : vector<16xf32>
    %16 = vector.multi_reduction <add>, %13, %cst_15 [1] : vector<16x256xf32> to vector<16xf32>
    %17 = vector.shape_cast %16 : vector<16xf32> to vector<16x1xf32>
    %18 = arith.addf %15, %17 : vector<16x1xf32>
    %cst_16 = arith.constant 0.001953125 : f32
    %19 = vector.broadcast %cst_16 : f32 to vector<16x1xf32>
    %20 = arith.mulf %18, %19 : vector<16x1xf32>
    %21 = vector.broadcast %20 : vector<16x1xf32> to vector<16x256xf32>
    %22 = arith.subf %12, %21 : vector<16x256xf32>
    %23 = vector.broadcast %20 : vector<16x1xf32> to vector<16x256xf32>
    %24 = arith.subf %13, %23 : vector<16x256xf32>
    %25 = arith.mulf %22, %22 : vector<16x256xf32>
    %cst_17 = arith.constant dense<0.000000e+00> : vector<16xf32>
    %26 = vector.multi_reduction <add>, %25, %cst_17 [1] : vector<16x256xf32> to vector<16xf32>
    %27 = vector.shape_cast %26 : vector<16xf32> to vector<16x1xf32>
    %28 = arith.mulf %24, %24 : vector<16x256xf32>
    %cst_18 = arith.constant dense<0.000000e+00> : vector<16xf32>
    %29 = vector.multi_reduction <add>, %28, %cst_18 [1] : vector<16x256xf32> to vector<16xf32>
    %30 = vector.shape_cast %29 : vector<16xf32> to vector<16x1xf32>
    %31 = arith.addf %27, %30 : vector<16x1xf32>
    %cst_19 = arith.constant 0.001953125 : f32
    %32 = vector.broadcast %cst_19 : f32 to vector<16x1xf32>
    %33 = arith.mulf %31, %32 : vector<16x1xf32>
    %cst_20 = arith.constant 9.99999974E-6 : f32
    %34 = vector.broadcast %cst_20 : f32 to vector<16x1xf32>
    %35 = arith.addf %33, %34 : vector<16x1xf32>
    %36 = math.rsqrt %35 : vector<16x1xf32>
    %37 = vector.broadcast %36 : vector<16x1xf32> to vector<16x256xf32>
    %38 = arith.mulf %22, %37 : vector<16x256xf32>
    %c0_21 = arith.constant 0 : index
    %c0_22 = arith.constant 0 : index
    %39 = vector.load %arg2[%c0_21, %c0_22] : memref<1x256xf32, #tpu.memory_space<vmem>>, vector<1x256xf32>
    %40 = vector.broadcast %39 : vector<1x256xf32> to vector<16x256xf32>
    %41 = arith.mulf %38, %40 : vector<16x256xf32>
    %c0_23 = arith.constant 0 : index
    %c0_24 = arith.constant 0 : index
    %42 = vector.load %arg3[%c0_23, %c0_24] : memref<1x256xf32, #tpu.memory_space<vmem>>, vector<1x256xf32>
    %43 = vector.broadcast %42 : vector<1x256xf32> to vector<16x256xf32>
    %44 = arith.addf %41, %43 : vector<16x256xf32>
    %45 = arith.truncf %44 : vector<16x256xf32> to vector<16x256xbf16>
    %c0_25 = arith.constant 0 : index
    %c0_26 = arith.constant 0 : index
    %46 = vector.load %arg18[%c0_25, %c0_26] : memref<16x256xbf16, #tpu.memory_space<vmem>>, vector<16x256xbf16>
    tpu.vector_store %arg18[%c0_25, %c0_26], %45 {strides = array<i32>} : memref<16x256xbf16, #tpu.memory_space<vmem>>, vector<16x256xbf16>,
    %47 = vector.broadcast %36 : vector<16x1xf32> to vector<16x256xf32>
    %48 = arith.mulf %24, %47 : vector<16x256xf32>
    %c0_27 = arith.constant 0 : index
    %c0_28 = arith.constant 0 : index
    %49 = vector.load %arg4[%c0_27, %c0_28] : memref<1x256xf32, #tpu.memory_space<vmem>>, vector<1x256xf32>
    %50 = vector.broadcast %49 : vector<1x256xf32> to vector<16x256xf32>
    %51 = arith.mulf %48, %50 : vector<16x256xf32>
    %c0_29 = arith.constant 0 : index
    %c0_30 = arith.constant 0 : index
    %52 = vector.load %arg5[%c0_29, %c0_30] : memref<1x256xf32, #tpu.memory_space<vmem>>, vector<1x256xf32>
    %53 = vector.broadcast %52 : vector<1x256xf32> to vector<16x256xf32>
    %54 = arith.addf %51, %53 : vector<16x256xf32>
    %55 = arith.truncf %54 : vector<16x256xf32> to vector<16x256xbf16>
    %c0_31 = arith.constant 0 : index
    %c0_32 = arith.constant 0 : index
    %56 = vector.load %arg19[%c0_31, %c0_32] : memref<16x256xbf16, #tpu.memory_space<vmem>>, vector<16x256xbf16>
    tpu.vector_store %arg19[%c0_31, %c0_32], %55 {strides = array<i32>} : memref<16x256xbf16, #tpu.memory_space<vmem>>, vector<16x256xbf16>,
    %c2_i32 = arith.constant 2 : i32
    %c2_i32_33 = arith.constant 2 : i32
    %c2_i32_34 = arith.constant 2 : i32
    %c0_i32_35 = arith.constant 0 : i32
    %c0_i32_36 = arith.constant 0 : i32
    %57 = tpu.memref_slice %arg14[%c2_i32, %c0_i32_35, %c0_i32_36] : memref<5x256x256xbf16, #tpu.memory_space<any>> -> memref<1x256x256xbf16, #tpu.memory_space<any>>
    %58 = tpu.memref_squeeze %57 : memref<1x256x256xbf16, #tpu.memory_space<any>> -> memref<256x256xbf16, #tpu.memory_space<any>>
    %c0_i32_37 = arith.constant 0 : i32
    %c0_i32_38 = arith.constant 0 : i32
    %59 = tpu.memref_slice %arg16[%c2_i32_33, %c0_i32_37, %c0_i32_38] : memref<3x256x256xbf16, #tpu.memory_space<vmem>> -> memref<1x256x256xbf16, #tpu.memory_space<vmem>>
    %60 = tpu.memref_squeeze %59 : memref<1x256x256xbf16, #tpu.memory_space<vmem>> -> memref<256x256xbf16, #tpu.memory_space<vmem>>
    %61 = tpu.memref_slice %arg17[%c2_i32_34] : memref<3x!tpu.dma_semaphore, #tpu.memory_space<semaphore_mem>> -> memref<1x!tpu.dma_semaphore, #tpu.memory_space<semaphore_mem>>
    %62 = tpu.memref_squeeze %61 : memref<1x!tpu.dma_semaphore, #tpu.memory_space<semaphore_mem>> -> memref<!tpu.dma_semaphore, #tpu.memory_space<semaphore_mem>>
    tpu.enqueue_dma source(%58 : memref<256x256xbf16, #tpu.memory_space<any>>) target(%60 : memref<256x256xbf16, #tpu.memory_space<vmem>>) target_semaphore(%62 : memref<!tpu.dma_semaphore, #tpu.memory_space<semaphore_mem>>)
    %c0_i32_39 = arith.constant 0 : i32
    %c0_i32_40 = arith.constant 0 : i32
    %c0_i32_41 = arith.constant 0 : i32
    %c0_i32_42 = arith.constant 0 : i32
    %c0_i32_43 = arith.constant 0 : i32
    %63 = tpu.memref_slice %arg14[%c0_i32_39, %c0_i32_42, %c0_i32_43] : memref<5x256x256xbf16, #tpu.memory_space<any>> -> memref<1x256x256xbf16, #tpu.memory_space<any>>
    %64 = tpu.memref_squeeze %63 : memref<1x256x256xbf16, #tpu.memory_space<any>> -> memref<256x256xbf16, #tpu.memory_space<any>>
    %c0_i32_44 = arith.constant 0 : i32
    %c0_i32_45 = arith.constant 0 : i32
    %65 = tpu.memref_slice %arg16[%c0_i32_40, %c0_i32_44, %c0_i32_45] : memref<3x256x256xbf16, #tpu.memory_space<vmem>> -> memref<1x256x256xbf16, #tpu.memory_space<vmem>>
    %66 = tpu.memref_squeeze %65 : memref<1x256x256xbf16, #tpu.memory_space<vmem>> -> memref<256x256xbf16, #tpu.memory_space<vmem>>
    %67 = tpu.memref_slice %arg17[%c0_i32_41] : memref<3x!tpu.dma_semaphore, #tpu.memory_space<semaphore_mem>> -> memref<1x!tpu.dma_semaphore, #tpu.memory_space<semaphore_mem>>
    %68 = tpu.memref_squeeze %67 : memref<1x!tpu.dma_semaphore, #tpu.memory_space<semaphore_mem>> -> memref<!tpu.dma_semaphore, #tpu.memory_space<semaphore_mem>>
    tpu.wait_dma2 semaphore(%68 : memref<!tpu.dma_semaphore, #tpu.memory_space<semaphore_mem>>) src(%64 : memref<256x256xbf16, #tpu.memory_space<any>>) dst(%66 : memref<256x256xbf16, #tpu.memory_space<vmem>>)
    %c0_46 = arith.constant 0 : index
    %c0_47 = arith.constant 0 : index
    %69 = vector.load %arg18[%c0_46, %c0_47] : memref<16x256xbf16, #tpu.memory_space<vmem>>, vector<16x256xbf16>
    %c0_48 = arith.constant 0 : index
    %c0_49 = arith.constant 0 : index
    %c0_50 = arith.constant 0 : index
    %70 = vector.load %arg16[%c0_48, %c0_49, %c0_50] : memref<3x256x256xbf16, #tpu.memory_space<vmem>>, vector<1x256x256xbf16>
    %71 = vector.shape_cast %70 : vector<1x256x256xbf16> to vector<256x256xbf16>
    %cst_51 = arith.constant dense<0.000000e+00> : vector<16x256xf32>
    %72 = tpu.matmul %69, %71, %cst_51 {dimension_numbers = #tpu.dot_dimension_numbers<[1], [0], [0], [1], [0, 0, 1, 1], [], []>} : vector<16x256xbf16>, vector<256x256xbf16>, vector<16x256xf32> -> vector<16x256xf32>
    %c3_i32 = arith.constant 3 : i32
    %c0_i32_52 = arith.constant 0 : i32
    %c0_i32_53 = arith.constant 0 : i32
    %c0_i32_54 = arith.constant 0 : i32
    %c0_i32_55 = arith.constant 0 : i32
    %73 = tpu.memref_slice %arg14[%c3_i32, %c0_i32_54, %c0_i32_55] : memref<5x256x256xbf16, #tpu.memory_space<any>> -> memref<1x256x256xbf16, #tpu.memory_space<any>>
    %74 = tpu.memref_squeeze %73 : memref<1x256x256xbf16, #tpu.memory_space<any>> -> memref<256x256xbf16, #tpu.memory_space<any>>
    %c0_i32_56 = arith.constant 0 : i32
    %c0_i32_57 = arith.constant 0 : i32
    %75 = tpu.memref_slice %arg16[%c0_i32_52, %c0_i32_56, %c0_i32_57] : memref<3x256x256xbf16, #tpu.memory_space<vmem>> -> memref<1x256x256xbf16, #tpu.memory_space<vmem>>
    %76 = tpu.memref_squeeze %75 : memref<1x256x256xbf16, #tpu.memory_space<vmem>> -> memref<256x256xbf16, #tpu.memory_space<vmem>>
    %77 = tpu.memref_slice %arg17[%c0_i32_53] : memref<3x!tpu.dma_semaphore, #tpu.memory_space<semaphore_mem>> -> memref<1x!tpu.dma_semaphore, #tpu.memory_space<semaphore_mem>>
    %78 = tpu.memref_squeeze %77 : memref<1x!tpu.dma_semaphore, #tpu.memory_space<semaphore_mem>> -> memref<!tpu.dma_semaphore, #tpu.memory_space<semaphore_mem>>
    tpu.enqueue_dma source(%74 : memref<256x256xbf16, #tpu.memory_space<any>>) target(%76 : memref<256x256xbf16, #tpu.memory_space<vmem>>) target_semaphore(%78 : memref<!tpu.dma_semaphore, #tpu.memory_space<semaphore_mem>>)
    %c1_i32_58 = arith.constant 1 : i32
    %c1_i32_59 = arith.constant 1 : i32
    %c1_i32_60 = arith.constant 1 : i32
    %c0_i32_61 = arith.constant 0 : i32
    %c0_i32_62 = arith.constant 0 : i32
    %79 = tpu.memref_slice %arg14[%c1_i32_58, %c0_i32_61, %c0_i32_62] : memref<5x256x256xbf16, #tpu.memory_space<any>> -> memref<1x256x256xbf16, #tpu.memory_space<any>>
    %80 = tpu.memref_squeeze %79 : memref<1x256x256xbf16, #tpu.memory_space<any>> -> memref<256x256xbf16, #tpu.memory_space<any>>
    %c0_i32_63 = arith.constant 0 : i32
    %c0_i32_64 = arith.constant 0 : i32
    %81 = tpu.memref_slice %arg16[%c1_i32_59, %c0_i32_63, %c0_i32_64] : memref<3x256x256xbf16, #tpu.memory_space<vmem>> -> memref<1x256x256xbf16, #tpu.memory_space<vmem>>
    %82 = tpu.memref_squeeze %81 : memref<1x256x256xbf16, #tpu.memory_space<vmem>> -> memref<256x256xbf16, #tpu.memory_space<vmem>>
    %83 = tpu.memref_slice %arg17[%c1_i32_60] : memref<3x!tpu.dma_semaphore, #tpu.memory_space<semaphore_mem>> -> memref<1x!tpu.dma_semaphore, #tpu.memory_space<semaphore_mem>>
    %84 = tpu.memref_squeeze %83 : memref<1x!tpu.dma_semaphore, #tpu.memory_space<semaphore_mem>> -> memref<!tpu.dma_semaphore, #tpu.memory_space<semaphore_mem>>
    tpu.wait_dma2 semaphore(%84 : memref<!tpu.dma_semaphore, #tpu.memory_space<semaphore_mem>>) src(%80 : memref<256x256xbf16, #tpu.memory_space<any>>) dst(%82 : memref<256x256xbf16, #tpu.memory_space<vmem>>)
    %c0_65 = arith.constant 0 : index
    %c0_66 = arith.constant 0 : index
    %85 = vector.load %arg19[%c0_65, %c0_66] : memref<16x256xbf16, #tpu.memory_space<vmem>>, vector<16x256xbf16>
    %c1 = arith.constant 1 : index
    %c0_67 = arith.constant 0 : index
    %c0_68 = arith.constant 0 : index
    %86 = vector.load %arg16[%c1, %c0_67, %c0_68] : memref<3x256x256xbf16, #tpu.memory_space<vmem>>, vector<1x256x256xbf16>
    %87 = vector.shape_cast %86 : vector<1x256x256xbf16> to vector<256x256xbf16>
    %cst_69 = arith.constant dense<0.000000e+00> : vector<16x256xf32>
    %88 = tpu.matmul %85, %87, %cst_69 {dimension_numbers = #tpu.dot_dimension_numbers<[1], [0], [0], [1], [0, 0, 1, 1], [], []>} : vector<16x256xbf16>, vector<256x256xbf16>, vector<16x256xf32> -> vector<16x256xf32>
    %89 = arith.addf %72, %88 : vector<16x256xf32>
    %c0_70 = arith.constant 0 : index
    %c0_71 = arith.constant 0 : index
    %90 = vector.load %arg20[%c0_70, %c0_71] : memref<16x256xf32, #tpu.memory_space<vmem>>, vector<16x256xf32>
    tpu.vector_store %arg20[%c0_70, %c0_71], %89 {strides = array<i32>} : memref<16x256xf32, #tpu.memory_space<vmem>>, vector<16x256xf32>,
    %c0_72 = arith.constant 0 : index
    %c0_73 = arith.constant 0 : index
    %91 = vector.load %arg20[%c0_72, %c0_73] : memref<16x256xf32, #tpu.memory_space<vmem>>, vector<16x256xf32>
    %c0_74 = arith.constant 0 : index
    %c0_75 = arith.constant 0 : index
    %92 = vector.load %arg6[%c0_74, %c0_75] : memref<1x256xf32, #tpu.memory_space<vmem>>, vector<1x256xf32>
    %93 = vector.broadcast %92 : vector<1x256xf32> to vector<16x256xf32>
    %94 = arith.addf %91, %93 : vector<16x256xf32>
    %cst_76 = arith.constant 5.000000e-01 : f32
    %95 = vector.broadcast %cst_76 : f32 to vector<16x256xf32>
    %96 = arith.mulf %95, %94 : vector<16x256xf32>
    %cst_77 = arith.constant 0.707106769 : f32
    %97 = vector.broadcast %cst_77 : f32 to vector<16x256xf32>
    %98 = arith.mulf %94, %97 : vector<16x256xf32>
    %99 = math.erf %98 : vector<16x256xf32>
    %cst_78 = arith.constant 1.000000e+00 : f32
    %100 = vector.broadcast %cst_78 : f32 to vector<16x256xf32>
    %101 = arith.addf %100, %99 : vector<16x256xf32>
    %102 = arith.mulf %96, %101 : vector<16x256xf32>
    %103 = arith.truncf %102 : vector<16x256xf32> to vector<16x256xbf16>
    %c0_79 = arith.constant 0 : index
    %c0_80 = arith.constant 0 : index
    %104 = vector.load %arg18[%c0_79, %c0_80] : memref<16x256xbf16, #tpu.memory_space<vmem>>, vector<16x256xbf16>
    tpu.vector_store %arg18[%c0_79, %c0_80], %103 {strides = array<i32>} : memref<16x256xbf16, #tpu.memory_space<vmem>>, vector<16x256xbf16>,
    %c4_i32 = arith.constant 4 : i32
    %c1_i32_81 = arith.constant 1 : i32
    %c1_i32_82 = arith.constant 1 : i32
    %c0_i32_83 = arith.constant 0 : i32
    %c0_i32_84 = arith.constant 0 : i32
    %105 = tpu.memref_slice %arg14[%c4_i32, %c0_i32_83, %c0_i32_84] : memref<5x256x256xbf16, #tpu.memory_space<any>> -> memref<1x256x256xbf16, #tpu.memory_space<any>>
    %106 = tpu.memref_squeeze %105 : memref<1x256x256xbf16, #tpu.memory_space<any>> -> memref<256x256xbf16, #tpu.memory_space<any>>
    %c0_i32_85 = arith.constant 0 : i32
    %c0_i32_86 = arith.constant 0 : i32
    %107 = tpu.memref_slice %arg16[%c1_i32_81, %c0_i32_85, %c0_i32_86] : memref<3x256x256xbf16, #tpu.memory_space<vmem>> -> memref<1x256x256xbf16, #tpu.memory_space<vmem>>
    %108 = tpu.memref_squeeze %107 : memref<1x256x256xbf16, #tpu.memory_space<vmem>> -> memref<256x256xbf16, #tpu.memory_space<vmem>>
    %109 = tpu.memref_slice %arg17[%c1_i32_82] : memref<3x!tpu.dma_semaphore, #tpu.memory_space<semaphore_mem>> -> memref<1x!tpu.dma_semaphore, #tpu.memory_space<semaphore_mem>>
    %110 = tpu.memref_squeeze %109 : memref<1x!tpu.dma_semaphore, #tpu.memory_space<semaphore_mem>> -> memref<!tpu.dma_semaphore, #tpu.memory_space<semaphore_mem>>
    tpu.enqueue_dma source(%106 : memref<256x256xbf16, #tpu.memory_space<any>>) target(%108 : memref<256x256xbf16, #tpu.memory_space<vmem>>) target_semaphore(%110 : memref<!tpu.dma_semaphore, #tpu.memory_space<semaphore_mem>>)
    %c2_i32_87 = arith.constant 2 : i32
    %c2_i32_88 = arith.constant 2 : i32
    %c2_i32_89 = arith.constant 2 : i32
    %c0_i32_90 = arith.constant 0 : i32
    %c0_i32_91 = arith.constant 0 : i32
    %111 = tpu.memref_slice %arg14[%c2_i32_87, %c0_i32_90, %c0_i32_91] : memref<5x256x256xbf16, #tpu.memory_space<any>> -> memref<1x256x256xbf16, #tpu.memory_space<any>>
    %112 = tpu.memref_squeeze %111 : memref<1x256x256xbf16, #tpu.memory_space<any>> -> memref<256x256xbf16, #tpu.memory_space<any>>
    %c0_i32_92 = arith.constant 0 : i32
    %c0_i32_93 = arith.constant 0 : i32
    %113 = tpu.memref_slice %arg16[%c2_i32_88, %c0_i32_92, %c0_i32_93] : memref<3x256x256xbf16, #tpu.memory_space<vmem>> -> memref<1x256x256xbf16, #tpu.memory_space<vmem>>
    %114 = tpu.memref_squeeze %113 : memref<1x256x256xbf16, #tpu.memory_space<vmem>> -> memref<256x256xbf16, #tpu.memory_space<vmem>>
    %115 = tpu.memref_slice %arg17[%c2_i32_89] : memref<3x!tpu.dma_semaphore, #tpu.memory_space<semaphore_mem>> -> memref<1x!tpu.dma_semaphore, #tpu.memory_space<semaphore_mem>>
    %116 = tpu.memref_squeeze %115 : memref<1x!tpu.dma_semaphore, #tpu.memory_space<semaphore_mem>> -> memref<!tpu.dma_semaphore, #tpu.memory_space<semaphore_mem>>
    tpu.wait_dma2 semaphore(%116 : memref<!tpu.dma_semaphore, #tpu.memory_space<semaphore_mem>>) src(%112 : memref<256x256xbf16, #tpu.memory_space<any>>) dst(%114 : memref<256x256xbf16, #tpu.memory_space<vmem>>)
    %c0_94 = arith.constant 0 : index
    %c0_95 = arith.constant 0 : index
    %117 = vector.load %arg18[%c0_94, %c0_95] : memref<16x256xbf16, #tpu.memory_space<vmem>>, vector<16x256xbf16>
    %c2 = arith.constant 2 : index
    %c0_96 = arith.constant 0 : index
    %c0_97 = arith.constant 0 : index
    %118 = vector.load %arg16[%c2, %c0_96, %c0_97] : memref<3x256x256xbf16, #tpu.memory_space<vmem>>, vector<1x256x256xbf16>
    %119 = vector.shape_cast %118 : vector<1x256x256xbf16> to vector<256x256xbf16>
    %cst_98 = arith.constant dense<0.000000e+00> : vector<16x256xf32>
    %120 = tpu.matmul %117, %119, %cst_98 {dimension_numbers = #tpu.dot_dimension_numbers<[1], [0], [0], [1], [0, 0, 1, 1], [], []>} : vector<16x256xbf16>, vector<256x256xbf16>, vector<16x256xf32> -> vector<16x256xf32>
    %c0_99 = arith.constant 0 : index
    %c0_100 = arith.constant 0 : index
    %121 = vector.load %arg20[%c0_99, %c0_100] : memref<16x256xf32, #tpu.memory_space<vmem>>, vector<16x256xf32>
    tpu.vector_store %arg20[%c0_99, %c0_100], %120 {strides = array<i32>} : memref<16x256xf32, #tpu.memory_space<vmem>>, vector<16x256xf32>,
    %c0_101 = arith.constant 0 : index
    %c0_102 = arith.constant 0 : index
    %122 = vector.load %arg20[%c0_101, %c0_102] : memref<16x256xf32, #tpu.memory_space<vmem>>, vector<16x256xf32>
    %c0_103 = arith.constant 0 : index
    %c0_104 = arith.constant 0 : index
    %123 = vector.load %arg7[%c0_103, %c0_104] : memref<1x256xf32, #tpu.memory_space<vmem>>, vector<1x256xf32>
    %124 = vector.broadcast %123 : vector<1x256xf32> to vector<16x256xf32>
    %125 = arith.addf %122, %124 : vector<16x256xf32>
    %c0_105 = arith.constant 0 : index
    %c0_106 = arith.constant 0 : index
    %126 = vector.load %arg0[%c0_105, %c0_106] : memref<16x256xf32, #tpu.memory_space<vmem>>, vector<16x256xf32>
    %127 = arith.addf %125, %126 : vector<16x256xf32>
    %c0_107 = arith.constant 0 : index
    %c0_108 = arith.constant 0 : index
    %128 = vector.load %arg21[%c0_107, %c0_108] : memref<16x256xf32, #tpu.memory_space<vmem>>, vector<16x256xf32>
    tpu.vector_store %arg21[%c0_107, %c0_108], %127 {strides = array<i32>} : memref<16x256xf32, #tpu.memory_space<vmem>>, vector<16x256xf32>,
    %c0_109 = arith.constant 0 : index
    %c0_110 = arith.constant 0 : index
    %129 = vector.load %arg21[%c0_109, %c0_110] : memref<16x256xf32, #tpu.memory_space<vmem>>, vector<16x256xf32>
    %cst_111 = arith.constant dense<0.000000e+00> : vector<16xf32>
    %130 = vector.multi_reduction <add>, %129, %cst_111 [1] : vector<16x256xf32> to vector<16xf32>
    %131 = vector.shape_cast %130 : vector<16xf32> to vector<16x1xf32>
    %cst_112 = arith.constant 2.560000e+02 : f32
    %132 = vector.broadcast %cst_112 : f32 to vector<16x1xf32>
    %133 = arith.divf %131, %132 : vector<16x1xf32>
    %134 = vector.broadcast %133 : vector<16x1xf32> to vector<16x256xf32>
    %135 = arith.subf %129, %134 : vector<16x256xf32>
    %136 = arith.mulf %135, %135 : vector<16x256xf32>
    %cst_113 = arith.constant dense<0.000000e+00> : vector<16xf32>
    %137 = vector.multi_reduction <add>, %136, %cst_113 [1] : vector<16x256xf32> to vector<16xf32>
    %138 = vector.shape_cast %137 : vector<16xf32> to vector<16x1xf32>
    %cst_114 = arith.constant 2.560000e+02 : f32
    %139 = vector.broadcast %cst_114 : f32 to vector<16x1xf32>
    %140 = arith.divf %138, %139 : vector<16x1xf32>
    %141 = vector.broadcast %133 : vector<16x1xf32> to vector<16x256xf32>
    %142 = arith.subf %129, %141 : vector<16x256xf32>
    %cst_115 = arith.constant 9.99999974E-6 : f32
    %143 = vector.broadcast %cst_115 : f32 to vector<16x1xf32>
    %144 = arith.addf %140, %143 : vector<16x1xf32>
    %145 = math.rsqrt %144 : vector<16x1xf32>
    %146 = vector.broadcast %145 : vector<16x1xf32> to vector<16x256xf32>
    %147 = arith.mulf %142, %146 : vector<16x256xf32>
    %c0_116 = arith.constant 0 : index
    %c0_117 = arith.constant 0 : index
    %148 = vector.load %arg8[%c0_116, %c0_117] : memref<1x256xf32, #tpu.memory_space<vmem>>, vector<1x256xf32>
    %149 = vector.broadcast %148 : vector<1x256xf32> to vector<16x256xf32>
    %150 = arith.mulf %147, %149 : vector<16x256xf32>
    %c0_118 = arith.constant 0 : index
    %c0_119 = arith.constant 0 : index
    %151 = vector.load %arg9[%c0_118, %c0_119] : memref<1x256xf32, #tpu.memory_space<vmem>>, vector<1x256xf32>
    %152 = vector.broadcast %151 : vector<1x256xf32> to vector<16x256xf32>
    %153 = arith.addf %150, %152 : vector<16x256xf32>
    %154 = arith.truncf %153 : vector<16x256xf32> to vector<16x256xbf16>
    %c0_120 = arith.constant 0 : index
    %c0_121 = arith.constant 0 : index
    %155 = vector.load %arg18[%c0_120, %c0_121] : memref<16x256xbf16, #tpu.memory_space<vmem>>, vector<16x256xbf16>
    tpu.vector_store %arg18[%c0_120, %c0_121], %154 {strides = array<i32>} : memref<16x256xbf16, #tpu.memory_space<vmem>>, vector<16x256xbf16>,
    %c3_i32_122 = arith.constant 3 : i32
    %c0_i32_123 = arith.constant 0 : i32
    %c0_i32_124 = arith.constant 0 : i32
    %c0_i32_125 = arith.constant 0 : i32
    %c0_i32_126 = arith.constant 0 : i32
    %156 = tpu.memref_slice %arg14[%c3_i32_122, %c0_i32_125, %c0_i32_126] : memref<5x256x256xbf16, #tpu.memory_space<any>> -> memref<1x256x256xbf16, #tpu.memory_space<any>>
    %157 = tpu.memref_squeeze %156 : memref<1x256x256xbf16, #tpu.memory_space<any>> -> memref<256x256xbf16, #tpu.memory_space<any>>
    %c0_i32_127 = arith.constant 0 : i32
    %c0_i32_128 = arith.constant 0 : i32
    %158 = tpu.memref_slice %arg16[%c0_i32_123, %c0_i32_127, %c0_i32_128] : memref<3x256x256xbf16, #tpu.memory_space<vmem>> -> memref<1x256x256xbf16, #tpu.memory_space<vmem>>
    %159 = tpu.memref_squeeze %158 : memref<1x256x256xbf16, #tpu.memory_space<vmem>> -> memref<256x256xbf16, #tpu.memory_space<vmem>>
    %160 = tpu.memref_slice %arg17[%c0_i32_124] : memref<3x!tpu.dma_semaphore, #tpu.memory_space<semaphore_mem>> -> memref<1x!tpu.dma_semaphore, #tpu.memory_space<semaphore_mem>>
    %161 = tpu.memref_squeeze %160 : memref<1x!tpu.dma_semaphore, #tpu.memory_space<semaphore_mem>> -> memref<!tpu.dma_semaphore, #tpu.memory_space<semaphore_mem>>
    tpu.wait_dma2 semaphore(%161 : memref<!tpu.dma_semaphore, #tpu.memory_space<semaphore_mem>>) src(%157 : memref<256x256xbf16, #tpu.memory_space<any>>) dst(%159 : memref<256x256xbf16, #tpu.memory_space<vmem>>)
    %c0_129 = arith.constant 0 : index
    %c0_130 = arith.constant 0 : index
    %162 = vector.load %arg18[%c0_129, %c0_130] : memref<16x256xbf16, #tpu.memory_space<vmem>>, vector<16x256xbf16>
    %c0_131 = arith.constant 0 : index
    %c0_132 = arith.constant 0 : index
    %c0_133 = arith.constant 0 : index
    %163 = vector.load %arg16[%c0_131, %c0_132, %c0_133] : memref<3x256x256xbf16, #tpu.memory_space<vmem>>, vector<1x256x256xbf16>
    %164 = vector.shape_cast %163 : vector<1x256x256xbf16> to vector<256x256xbf16>
    %cst_134 = arith.constant dense<0.000000e+00> : vector<16x256xf32>
    %165 = tpu.matmul %162, %164, %cst_134 {dimension_numbers = #tpu.dot_dimension_numbers<[1], [0], [0], [1], [0, 0, 1, 1], [], []>} : vector<16x256xbf16>, vector<256x256xbf16>, vector<16x256xf32> -> vector<16x256xf32>
    %c0_135 = arith.constant 0 : index
    %c0_136 = arith.constant 0 : index
    %166 = vector.load %arg20[%c0_135, %c0_136] : memref<16x256xf32, #tpu.memory_space<vmem>>, vector<16x256xf32>
    tpu.vector_store %arg20[%c0_135, %c0_136], %165 {strides = array<i32>} : memref<16x256xf32, #tpu.memory_space<vmem>>, vector<16x256xf32>,
    %c0_137 = arith.constant 0 : index
    %c0_138 = arith.constant 0 : index
    %167 = vector.load %arg20[%c0_137, %c0_138] : memref<16x256xf32, #tpu.memory_space<vmem>>, vector<16x256xf32>
    %c0_139 = arith.constant 0 : index
    %c0_140 = arith.constant 0 : index
    %168 = vector.load %arg10[%c0_139, %c0_140] : memref<1x256xf32, #tpu.memory_space<vmem>>, vector<1x256xf32>
    %169 = vector.broadcast %168 : vector<1x256xf32> to vector<16x256xf32>
    %170 = arith.addf %167, %169 : vector<16x256xf32>
    %cst_141 = arith.constant 5.000000e-01 : f32
    %171 = vector.broadcast %cst_141 : f32 to vector<16x256xf32>
    %172 = arith.mulf %171, %170 : vector<16x256xf32>
    %cst_142 = arith.constant 0.707106769 : f32
    %173 = vector.broadcast %cst_142 : f32 to vector<16x256xf32>
    %174 = arith.mulf %170, %173 : vector<16x256xf32>
    %175 = math.erf %174 : vector<16x256xf32>
    %cst_143 = arith.constant 1.000000e+00 : f32
    %176 = vector.broadcast %cst_143 : f32 to vector<16x256xf32>
    %177 = arith.addf %176, %175 : vector<16x256xf32>
    %178 = arith.mulf %172, %177 : vector<16x256xf32>
    %179 = arith.truncf %178 : vector<16x256xf32> to vector<16x256xbf16>
    %c0_144 = arith.constant 0 : index
    %c0_145 = arith.constant 0 : index
    %180 = vector.load %arg18[%c0_144, %c0_145] : memref<16x256xbf16, #tpu.memory_space<vmem>>, vector<16x256xbf16>
    tpu.vector_store %arg18[%c0_144, %c0_145], %179 {strides = array<i32>} : memref<16x256xbf16, #tpu.memory_space<vmem>>, vector<16x256xbf16>,
    %c4_i32_146 = arith.constant 4 : i32
    %c1_i32_147 = arith.constant 1 : i32
    %c1_i32_148 = arith.constant 1 : i32
    %c0_i32_149 = arith.constant 0 : i32
    %c0_i32_150 = arith.constant 0 : i32
    %181 = tpu.memref_slice %arg14[%c4_i32_146, %c0_i32_149, %c0_i32_150] : memref<5x256x256xbf16, #tpu.memory_space<any>> -> memref<1x256x256xbf16, #tpu.memory_space<any>>
    %182 = tpu.memref_squeeze %181 : memref<1x256x256xbf16, #tpu.memory_space<any>> -> memref<256x256xbf16, #tpu.memory_space<any>>
    %c0_i32_151 = arith.constant 0 : i32
    %c0_i32_152 = arith.constant 0 : i32
    %183 = tpu.memref_slice %arg16[%c1_i32_147, %c0_i32_151, %c0_i32_152] : memref<3x256x256xbf16, #tpu.memory_space<vmem>> -> memref<1x256x256xbf16, #tpu.memory_space<vmem>>
    %184 = tpu.memref_squeeze %183 : memref<1x256x256xbf16, #tpu.memory_space<vmem>> -> memref<256x256xbf16, #tpu.memory_space<vmem>>
    %185 = tpu.memref_slice %arg17[%c1_i32_148] : memref<3x!tpu.dma_semaphore, #tpu.memory_space<semaphore_mem>> -> memref<1x!tpu.dma_semaphore, #tpu.memory_space<semaphore_mem>>
    %186 = tpu.memref_squeeze %185 : memref<1x!tpu.dma_semaphore, #tpu.memory_space<semaphore_mem>> -> memref<!tpu.dma_semaphore, #tpu.memory_space<semaphore_mem>>
    tpu.wait_dma2 semaphore(%186 : memref<!tpu.dma_semaphore, #tpu.memory_space<semaphore_mem>>) src(%182 : memref<256x256xbf16, #tpu.memory_space<any>>) dst(%184 : memref<256x256xbf16, #tpu.memory_space<vmem>>)
    %c0_153 = arith.constant 0 : index
    %c0_154 = arith.constant 0 : index
    %187 = vector.load %arg18[%c0_153, %c0_154] : memref<16x256xbf16, #tpu.memory_space<vmem>>, vector<16x256xbf16>
    %c1_155 = arith.constant 1 : index
    %c0_156 = arith.constant 0 : index
    %c0_157 = arith.constant 0 : index
    %188 = vector.load %arg16[%c1_155, %c0_156, %c0_157] : memref<3x256x256xbf16, #tpu.memory_space<vmem>>, vector<1x256x256xbf16>
    %189 = vector.shape_cast %188 : vector<1x256x256xbf16> to vector<256x256xbf16>
    %cst_158 = arith.constant dense<0.000000e+00> : vector<16x256xf32>
    %190 = tpu.matmul %187, %189, %cst_158 {dimension_numbers = #tpu.dot_dimension_numbers<[1], [0], [0], [1], [0, 0, 1, 1], [], []>} : vector<16x256xbf16>, vector<256x256xbf16>, vector<16x256xf32> -> vector<16x256xf32>
    %c0_159 = arith.constant 0 : index
    %c0_160 = arith.constant 0 : index
    %191 = vector.load %arg20[%c0_159, %c0_160] : memref<16x256xf32, #tpu.memory_space<vmem>>, vector<16x256xf32>
    tpu.vector_store %arg20[%c0_159, %c0_160], %190 {strides = array<i32>} : memref<16x256xf32, #tpu.memory_space<vmem>>, vector<16x256xf32>,
    %c0_161 = arith.constant 0 : index
    %c0_162 = arith.constant 0 : index
    %192 = vector.load %arg20[%c0_161, %c0_162] : memref<16x256xf32, #tpu.memory_space<vmem>>, vector<16x256xf32>
    %c0_163 = arith.constant 0 : index
    %c0_164 = arith.constant 0 : index
    %193 = vector.load %arg11[%c0_163, %c0_164] : memref<1x256xf32, #tpu.memory_space<vmem>>, vector<1x256xf32>
    %194 = vector.broadcast %193 : vector<1x256xf32> to vector<16x256xf32>
    %195 = arith.addf %192, %194 : vector<16x256xf32>
    %c0_165 = arith.constant 0 : index
    %c0_166 = arith.constant 0 : index
    %196 = vector.load %arg21[%c0_165, %c0_166] : memref<16x256xf32, #tpu.memory_space<vmem>>, vector<16x256xf32>
    %197 = arith.addf %195, %196 : vector<16x256xf32>
    %cst_167 = arith.constant dense<0.000000e+00> : vector<16xf32>
    %198 = vector.multi_reduction <add>, %197, %cst_167 [1] : vector<16x256xf32> to vector<16xf32>
    %199 = vector.shape_cast %198 : vector<16xf32> to vector<16x1xf32>
    %cst_168 = arith.constant 2.560000e+02 : f32
    %200 = vector.broadcast %cst_168 : f32 to vector<16x1xf32>
    %201 = arith.divf %199, %200 : vector<16x1xf32>
    %202 = vector.broadcast %201 : vector<16x1xf32> to vector<16x256xf32>
    %203 = arith.subf %197, %202 : vector<16x256xf32>
    %204 = arith.mulf %203, %203 : vector<16x256xf32>
    %cst_169 = arith.constant dense<0.000000e+00> : vector<16xf32>
    %205 = vector.multi_reduction <add>, %204, %cst_169 [1] : vector<16x256xf32> to vector<16xf32>
    %206 = vector.shape_cast %205 : vector<16xf32> to vector<16x1xf32>
    %cst_170 = arith.constant 2.560000e+02 : f32
    %207 = vector.broadcast %cst_170 : f32 to vector<16x1xf32>
    %208 = arith.divf %206, %207 : vector<16x1xf32>
    %209 = vector.broadcast %201 : vector<16x1xf32> to vector<16x256xf32>
    %210 = arith.subf %197, %209 : vector<16x256xf32>
    %cst_171 = arith.constant 9.99999974E-6 : f32
    %211 = vector.broadcast %cst_171 : f32 to vector<16x1xf32>
    %212 = arith.addf %208, %211 : vector<16x1xf32>
    %213 = math.rsqrt %212 : vector<16x1xf32>
    %214 = vector.broadcast %213 : vector<16x1xf32> to vector<16x256xf32>
    %215 = arith.mulf %210, %214 : vector<16x256xf32>
    %c0_172 = arith.constant 0 : index
    %c0_173 = arith.constant 0 : index
    %216 = vector.load %arg12[%c0_172, %c0_173] : memref<1x256xf32, #tpu.memory_space<vmem>>, vector<1x256xf32>
    %217 = vector.broadcast %216 : vector<1x256xf32> to vector<16x256xf32>
    %218 = arith.mulf %215, %217 : vector<16x256xf32>
    %c0_174 = arith.constant 0 : index
    %c0_175 = arith.constant 0 : index
    %219 = vector.load %arg13[%c0_174, %c0_175] : memref<1x256xf32, #tpu.memory_space<vmem>>, vector<1x256xf32>
    %220 = vector.broadcast %219 : vector<1x256xf32> to vector<16x256xf32>
    %221 = arith.addf %218, %220 : vector<16x256xf32>
    %c0_176 = arith.constant 0 : index
    %c0_177 = arith.constant 0 : index
    %222 = vector.load %arg15[%c0_176, %c0_177] : memref<16x256xf32, #tpu.memory_space<vmem>>, vector<16x256xf32>
    tpu.vector_store %arg15[%c0_176, %c0_177], %221 {strides = array<i32>} : memref<16x256xf32, #tpu.memory_space<vmem>>, vector<16x256xf32>,
    return
  }
}

</mosaic_0001>

<bundles_post_ra>
// kernel: tpu_custom_call.1
= control target key start
LH: loop header
LB: loop body
LE: loop exit
PB: predicated region body
PF: predicated region fallthrough
CT: control target
= control target key end

     0   :  { %20 = vsyncpa [#allocation9], 0  ;;  %s1770_s0 = inlined_call_operand.hbm [shape: f32[16,256], index: 0, kind: input, shape index: {}]   ;;  %s1771_s1 = inlined_call_operand.hbm [shape: f32[16,256], index: 1, kind: input, shape index: {}]   ;;  %s1772_s2 = inlined_call_operand.vmem [shape: f32[1,256], index: 2, kind: input, shape index: {}]   ;;  %s1773_s3 = inlined_call_operand.vmem [shape: f32[1,256], index: 3, kind: input, shape index: {}]   ;;  %s1774_s4 = inlined_call_operand.vmem [shape: f32[1,256], index: 4, kind: input, shape index: {}]   ;;  %s1775_s5 = inlined_call_operand.vmem [shape: f32[1,256], index: 5, kind: input, shape index: {}]   ;;  %s1776_s6 = inlined_call_operand.vmem [shape: f32[1,256], index: 6, kind: input, shape index: {}]   ;;  %s1777_s7 = inlined_call_operand.vmem [shape: f32[1,256], index: 7, kind: input, shape index: {}]   ;;  %s1778_s8 = inlined_call_operand.vmem [shape: f32[1,256], index: 8, kind: input, shape index: {}]   ;;  %s1779_s9 = inlined_call_operand.vmem [shape: f32[1,256], index: 9, kind: input, shape index: {}]   ;;  %s1780_s10 = inlined_call_operand.vmem [shape: f32[1,256], index: 10, kind: input, shape index: {}]   ;;  %s1781_s11 = inlined_call_operand.vmem [shape: f32[1,256], index: 11, kind: input, shape index: {}]   ;;  %s1782_s12 = inlined_call_operand.vmem [shape: f32[1,256], index: 12, kind: input, shape index: {}]   ;;  %s1783_s13 = inlined_call_operand.vmem [shape: f32[1,256], index: 13, kind: input, shape index: {}]   ;;  %s1784_s14 = inlined_call_operand.hbm [shape: bf16[5,256,256], index: 14, kind: input, shape index: {}]   ;;  %s1785_s15 = inlined_call_operand.hbm [shape: f32[16,256], index: 15, kind: output, shape index: {}]  }
   0x1   :  { %21 = vsyncpa [#allocation12], 0 }
   0x2   :  { %22 = vsyncpa [#allocation10], 0  ;;  %s1283_s18 = smov [#allocation8]   ;;  %s1201_s22 = scalar_lea.hbm %s1770_s0, 512 }
   0x3   :  { %s28_s19 = sshll.u32 %s1283_s18, 4  ;;  %p1202_p0 = scmp.ne.s32.totalorder %s1770_s0, %s1201_s22  ;;  %s29_s19 = int_to_ptr.vmem [resolvable:$true] %s28_s19 }
   0x4   :  { %p1205_p1 = scmp.lt.u32.totalorder %s1201_s22, %s1770_s0 }
   0x6   :  { %p1207_p2 = pnand %p1205_p1, %p1202_p0 }
   0x8   :  { %1210 = shalt.err (!%p1207_p2)
}
   0x9   :  { %s1211_s27 = scalar_lea.vmem %s29_s19, 512  ;;  %p1216_p4 = scmp.lt.s32.totalorder %s29_s19, %s29_s19 }
   0xa   :  { %p1212_p3 = scmp.ne.s32.totalorder %s29_s19, %s1211_s27  ;;  %p1217_p5 = scmp.lt.s32.totalorder %s1211_s27, %s1211_s27 }
   0xc   :  { %p1218_p6 = por %p1217_p5, %p1216_p4 }
   0xe   :  { %p1219_p7 = pnand %p1218_p6, %p1212_p3 }
  0x10   :  { %1222 = shalt.err (!%p1219_p7)
}
  0x11   :  { %s1284_s28 = smov 256   ;;  %s1786_s29 = smov 16  }
  0x12   :  { %34 = dma.hbm_to_vmem [thread:$0]  %s1770_s0, 512, %s29_s19, [#allocation9], %s1284_s28, %s1284_s28, %s1786_s29  }
  0x13   :  { %s1286_s17 = smov [#allocation11]   ;;  %s1223_s22 = scalar_lea.hbm %s1771_s1, 512 }
  0x14   :  { %s40_s18 = sshll.u32 %s1286_s17, 4  ;;  %p1224_p8 = scmp.ne.s32.totalorder %s1771_s1, %s1223_s22  ;;  %s41_s18 = int_to_ptr.vmem [resolvable:$true] %s40_s18 }
  0x15   :  { %p1227_p9 = scmp.lt.u32.totalorder %s1223_s22, %s1771_s1 }
  0x17   :  { %p1229_p10 = pnand %p1227_p9, %p1224_p8 }
  0x19   :  { %1232 = shalt.err (!%p1229_p10)
}
  0x1a   :  { %s1233_s27 = scalar_lea.vmem %s41_s18, 512  ;;  %p1238_p12 = scmp.lt.s32.totalorder %s41_s18, %s41_s18 }
  0x1b   :  { %p1234_p11 = scmp.ne.s32.totalorder %s41_s18, %s1233_s27  ;;  %p1239_p13 = scmp.lt.s32.totalorder %s1233_s27, %s1233_s27 }
  0x1d   :  { %p1240_p0 = por %p1239_p13, %p1238_p12 }
  0x1f   :  { %p1241_p1 = pnand %p1240_p0, %p1234_p11 }
  0x21   :  { %1244 = shalt.err (!%p1241_p1)
}
  0x22   :  { %46 = dma.hbm_to_vmem [thread:$0]  %s1771_s1, 512, %s41_s18, [#allocation12], %s1284_s28, %s1284_s28, %s1786_s29  }
  0x23   :  { %1267 = dma.done.wait [#allocation9], 512  }
  0x24   :  { %1268 = vsyncadd [#allocation9], 4294966784 }
  0x25   :  { %1269 = dma.done.wait [#allocation12], 512  }
  0x26   :  { %1270 = vsyncadd [#allocation12], 4294966784  ;;  %s81_s30 = sld [smem:[#allocation0]]   ;;  %93 = sst [smem:[#allocation15]] %s1284_s28  ;;  %v215_v49 = vlaneseq }
  0x27   :  { %95 = sst [smem:[#allocation15 + $0x1]] %s1284_s28  ;;  %s1287_s16 = smov 2  }
  0x28   :  { %97 = sst [smem:[#allocation15 + $0x2]] %s1287_s16  ;;  %s1288_s17 = smov 64   ;;  %v216_v54 = vshrl.u32 %v215_v49, 7 }
  0x29   :  { %99 = sst [smem:[#allocation15 + $0x3]] %s1288_s17  ;;  %s1289_s20 = smov [#allocation2]  }
  0x2a   :  { %s1417_s21 = sshll.u32 %s1289_s20, 4  ;;  %s1795_s1 = smov 128   ;;  %v1494_v56 = vsub.s32 0, %v216_v54  ;;  %v1496_v57 = vsub.s32 1, %v216_v54  ;;  %s1792_s21 = int_to_ptr.vmem [resolvable:$true] %s1417_s21 }
  0x2b   :  { %1797 = sst [smem:[#allocation32_spill]] %s1417_s21  ;;  %s1793_s23 = smov 4  }
  0x2c   :  { %101 = sst [smem:[#allocation15 + $0x4]] %s1795_s1  ;;  %s1136_s18 = sshll.u32 %s81_s30, 26 }
  0x2d   :  { %103 = sst [smem:[#allocation15 + $0x5]] %s1287_s16  ;;  %s1423_s22 = sadd.s32 134217728, %s1136_s18 }
  0x2e   :  { %105 = sst [smem:[#allocation15 + $0x6]] %s1795_s1  ;;  %s1790_s24 = smov [#allocation3]  }
  0x2f   :  { %107 = sst [smem:[#allocation15 + $0x7]] %s1288_s17  ;;  %s1293_s25 = smov [#allocation14]  }
  0x30   :  { %109 = sst [smem:[#allocation15 + $0x8]] %s1793_s23  ;;  %s1294_s0 = smov [#allocation2 + $0x100]  }
  0x31   :  { %111 = dma.general %s1784_s14, 4096, %s1792_s21, %s1790_s24, %s1293_s25, [#allocation15], %s1423_s22, 0  }
  0x32   :  { %130 = sst [smem:[#allocation17]] %s1284_s28  ;;  %s1436_s19 = sshll.u32 %s1294_s0, 4  ;;  %s1789_s19 = int_to_ptr.vmem [resolvable:$true] %s1436_s19 }
  0x33   :  { %132 = sst [smem:[#allocation17 + $0x1]] %s1284_s28  ;;  %s112_s18 = scalar_lea.hbm %s1784_s14, 4096 }
  0x34   :  { %1798 = sst [smem:[#allocation33_spill]] %s1436_s19  ;;  %s1787_s25 = smov [#allocation3 + $0x1]  }
  0x35   :  { %134 = sst [smem:[#allocation17 + $0x2]] %s1287_s16  ;;  %s1296_s26 = smov [#allocation16]  }
  0x36   :  { %136 = sst [smem:[#allocation17 + $0x3]] %s1288_s17  ;;  %s1297_s27 = smov [#allocation2 + $0x200]  }
  0x37   :  { %138 = sst [smem:[#allocation17 + $0x4]] %s1795_s1  ;;  %s303_s0 = sshll.u32 %s1297_s27, 4  ;;  %s304_s0 = int_to_ptr.vmem [resolvable:$true] %s303_s0 }
  0x38   :  { %140 = sst [smem:[#allocation17 + $0x5]] %s1287_s16  ;;  %s1298_s27 = smov [#allocation3 + $0x2]  }
  0x39   :  { %142 = sst [smem:[#allocation17 + $0x6]] %s1795_s1  ;;  %s1299_s30 = smov [#allocation18]  }
  0x3a   :  { %144 = sst [smem:[#allocation17 + $0x7]] %s1288_s17 }
  0x3b   :  { %146 = sst [smem:[#allocation17 + $0x8]] %s1793_s23 }
  0x3c   :  { %148 = dma.general %s112_s18, 4096, %s1789_s19, %s1787_s25, %s1296_s26, [#allocation17], %s1423_s22, 0  }
  0x3d   :  { %307 = sst [smem:[#allocation19]] %s1284_s28  ;;  %v153_v0 = vld [vmem:[#allocation11] sm:$0xff]  ;;  %v154_v1 = vld [vmem:[#allocation11 + $0x8] sm:$0xff]  ;;  %v155_v5 = vld [vmem:[#allocation11 + $0x10] sm:$0xff]  ;;  %s289_s19 = scalar_lea.hbm %s1784_s14, 8192 }
  0x3e   :  { %309 = sst [smem:[#allocation19 + $0x1]] %s1284_s28  ;;  %v149_v2 = vld [vmem:[#allocation8] sm:$0xff]  ;;  %v163_v3 = vadd.f32 %v154_v1, %v153_v0  ;;  %v150_v4 = vld [vmem:[#allocation8 + $0x8] sm:$0xff]  ;;  %v156_v6 = vld [vmem:[#allocation11 + $0x18] sm:$0xff] }
  0x3f   :  { %311 = sst [smem:[#allocation19 + $0x2]] %s1287_s16  ;;  %v157_v7 = vadd.f32 %v150_v4, %v149_v2  ;;  %v151_v8 = vld [vmem:[#allocation8 + $0x10] sm:$0xff]  ;;  %v152_v9 = vld [vmem:[#allocation8 + $0x18] sm:$0xff]  ;;  %v166_v10 = vadd.f32 %v156_v6, %v155_v5  ;;  %v213_v40 = vld [vmem:[%s1772_s2] sm:$0x3] }
  0x40   :  { %313 = sst [smem:[#allocation19 + $0x3]] %s1288_s17  ;;  %164 = vadd.xlane.f32.xlu1 %v163_v3  ;;  %v160_v11 = vadd.f32 %v152_v9, %v151_v8  ;;  %v229_v41 = vld [vmem:[%s1773_s3] sm:$0x3]  ;;  %v218_v58 = vrot.slane %v213_v40, %v1494_v56  ;;  %v222_v59 = vrot.slane %v213_v40, %v1496_v57 }
  0x41   :  { %315 = sst [smem:[#allocation19 + $0x4]] %s1795_s1  ;;  %158 = vadd.xlane.f32.xlu0 %v157_v7  ;;  %v253_v42 = vld [vmem:[%s1774_s4] sm:$0x3]  ;;  %v234_v63 = vrot.slane %v229_v41, %v1494_v56 }
  0x42   :  { %317 = sst [smem:[#allocation19 + $0x5]] %s1287_s16  ;;  %v269_v43 = vld [vmem:[%s1775_s5] sm:$0x3]  ;;  %v258_v60 = vrot.slane %v253_v42, %v1494_v56  ;;  %v262_v61 = vrot.slane %v253_v42, %v1496_v57 }
  0x43   :  { %319 = sst [smem:[#allocation19 + $0x6]] %s1795_s1 }
  0x44   :  { %321 = sst [smem:[#allocation19 + $0x7]] %s1288_s17  ;;  %167 = vadd.xlane.f32.xlu1 %v166_v10 }
  0x45   :  { %323 = sst [smem:[#allocation19 + $0x8]] %s1793_s23  ;;  %161 = vadd.xlane.f32.xlu0 %v160_v11 }
  0x46   :  { %325 = dma.general %s289_s19, 4096, %s304_s0, %s1298_s27, %s1299_s30, [#allocation19], %s1423_s22, 0  }
  0xcd   :  { %v165_v12 = vpop.xlane.xlu1 %164 }
  0xce   :  { %v159_v13 = vpop.xlane.xlu0 %158 }
  0xcf   :  { %v169_v14 = vadd.f32 %v165_v12, %v159_v13 }
  0xd1   :  { %v171_v15 = vmul.f32 0.001953125, %v169_v14  ;;  %v168_v16 = vpop.xlane.xlu1 %167 }
  0xd2   :  { %v162_v17 = vpop.xlane.xlu0 %161 }
  0xd3   :  { %v170_v18 = vadd.f32 %v168_v16, %v162_v17  ;;  %v173_v19 = vsub.f32 %v149_v2, %v171_v15  ;;  %v174_v20 = vsub.f32 %v150_v4, %v171_v15  ;;  %v177_v21 = vsub.f32 %v153_v0, %v171_v15 }
  0xd4   :  { %v178_v22 = vsub.f32 %v154_v1, %v171_v15  ;;  %v238_v0 = vrot.slane %v229_v41, %v1496_v57  ;;  %v274_v1 = vrot.slane %v269_v43, %v1494_v56  ;;  %v278_v2 = vrot.slane %v269_v43, %v1496_v57 }
  0xd5   :  { %v172_v23 = vmul.f32 0.001953125, %v170_v18  ;;  %v181_v24 = vmul.f32 %v173_v19, %v173_v19  ;;  %v182_v25 = vmul.f32 %v174_v20, %v174_v20  ;;  %v191_v26 = vmul.f32 %v177_v21, %v177_v21 }
  0xd6   :  { %v192_v27 = vmul.f32 %v178_v22, %v178_v22 }
  0xd7   :  { %v185_v28 = vadd.f32 %v182_v25, %v181_v24  ;;  %v1462_v29 = vsub.f32 %v151_v8, %v172_v23  ;;  %v1464_v30 = vsub.f32 %v152_v9, %v172_v23  ;;  %v1466_v31 = vsub.f32 %v155_v5, %v172_v23 }
  0xd8   :  { %v1468_v32 = vsub.f32 %v156_v6, %v172_v23  ;;  %v195_v35 = vadd.f32 %v192_v27, %v191_v26 }
  0xd9   :  { %186 = vadd.xlane.f32.xlu0 %v185_v28  ;;  %v183_v33 = vmul.f32 %v1462_v29, %v1462_v29  ;;  %v184_v34 = vmul.f32 %v1464_v30, %v1464_v30  ;;  %v193_v37 = vmul.f32 %v1466_v31, %v1466_v31 }
  0xda   :  { %v194_v38 = vmul.f32 %v1468_v32, %v1468_v32 }
  0xdb   :  { %v188_v36 = vadd.f32 %v184_v34, %v183_v33 }
  0xdc   :  { %v198_v39 = vadd.f32 %v194_v38, %v193_v37 }
  0xdd   :  { %196 = vadd.xlane.f32.xlu0 %v195_v35  ;;  %189 = vadd.xlane.f32.xlu1 %v188_v36 }
  0xe1   :  { %199 = vadd.xlane.f32.xlu1 %v198_v39 }
 0x166   :  { %v187_v44 = vpop.xlane.xlu0 %186 }
 0x16a   :  { %v190_v45 = vpop.xlane.xlu1 %189  ;;  %v197_v46 = vpop.xlane.xlu0 %196 }
 0x16b   :  { %v201_v47 = vadd.f32 %v197_v46, %v187_v44 }
 0x16d   :  { %v203_v48 = vmul.f32 0.001953125, %v201_v47 }
 0x16e   :  { %v200_v50 = vpop.xlane.xlu1 %199 }
 0x16f   :  { %v205_v51 = vadd.f32 1e-05, %v203_v48  ;;  %v202_v52 = vadd.f32 %v200_v50, %v190_v45 }
 0x171   :  { %1173 = vrsqrt.f32 %v205_v51  ;;  %v204_v53 = vmul.f32 0.001953125, %v202_v52 }
 0x173   :  { %v206_v55 = vadd.f32 1e-05, %v204_v53 }
 0x175   :  { %1175 = vrsqrt.f32 %v206_v55 }
 0x17b   :  { %v1174_v62 = vpop.eup %1173 }
 0x17c   :  { %v209_v3 = vmul.f32 %v1174_v62, %v173_v19  ;;  %v210_v4 = vmul.f32 %v1174_v62, %v174_v20  ;;  %v249_v5 = vmul.f32 %v1174_v62, %v177_v21  ;;  %v250_v6 = vmul.f32 %v1174_v62, %v178_v22 }
 0x17e   :  { %v225_v7 = vmul.f32 %v218_v58, %v209_v3  ;;  %v226_v8 = vmul.f32 %v222_v59, %v210_v4  ;;  %v265_v9 = vmul.f32 %v258_v60, %v249_v5  ;;  %v266_v10 = vmul.f32 %v262_v61, %v250_v6 }
 0x17f   :  { %v1176_v11 = vpop.eup %1175 }
 0x180   :  { %v1506_v12 = vadd.f32 %v234_v63, %v225_v7  ;;  %v1508_v13 = vadd.f32 %v238_v0, %v226_v8  ;;  %v1510_v14 = vadd.f32 %v274_v1, %v265_v9  ;;  %v1512_v15 = vadd.f32 %v278_v2, %v266_v10 }
 0x181   :  { %v211_v16 = vmul.f32 %v1176_v11, %v1462_v29  ;;  %v212_v17 = vmul.f32 %v1176_v11, %v1464_v30  ;;  %v251_v18 = vmul.f32 %v1176_v11, %v1466_v31  ;;  %v252_v19 = vmul.f32 %v1176_v11, %v1468_v32 }
 0x183   :  { %v227_v20 = vmul.f32 %v218_v58, %v211_v16  ;;  %v228_v21 = vmul.f32 %v222_v59, %v212_v17  ;;  %v267_v22 = vmul.f32 %v258_v60, %v251_v18  ;;  %v268_v23 = vmul.f32 %v262_v61, %v252_v19 }
 0x185   :  { %v1518_v24 = vadd.f32 %v234_v63, %v227_v20  ;;  %v1520_v25 = vadd.f32 %v238_v0, %v228_v21  ;;  %v1522_v26 = vadd.f32 %v274_v1, %v267_v22  ;;  %v284_v27 = vadd.f32 %v278_v2, %v268_v23 }
 0x187   :  { %v245_v28 = vpack.c.bf16 %v1518_v24, %v1506_v12  ;;  %v246_v29 = vpack.c.bf16 %v1520_v25, %v1508_v13  ;;  %v285_v30 = vpack.c.bf16 %v1522_v26, %v1510_v14  ;;  %v286_v31 = vpack.c.bf16 %v284_v27, %v1512_v15 }
 0x188   :  { %1271 = dma.done.wait [#allocation3], 4096 }
 0x189   :  { %1272 = vsyncadd [#allocation3], 4294963200  ;;  %380 = sst [smem:[#allocation21]] %s1284_s28  ;;  %s1799_s2 = smov 128   ;;  %v1538_v32 = vld [vmem:[#allocation2] sm:$0xff]  ;;  %v1540_v33 = vld [vmem:[#allocation2 + $0x8] sm:$0xff] }
 0x18a   :  { %382 = sst [smem:[#allocation21 + $0x1]] %s1284_s28  ;;  %v1542_v34 = vld [vmem:[#allocation2 + $0x10] sm:$0xff]  ;;  %v1545_v35 = vld [vmem:[#allocation2 + $0x18] sm:$0xff]  ;;  %v1547_v36 = vld [vmem:[#allocation2 + $0x20] sm:$0xff]  ;;  %s1800_s3 = smov 4  }
 0x18b   :  { %384 = sst [smem:[#allocation21 + $0x2]] %s1287_s16  ;;  %v1549_v37 = vld [vmem:[#allocation2 + $0x28] sm:$0xff]  ;;  %v1552_v38 = vld [vmem:[#allocation2 + $0x30] sm:$0xff]  ;;  %v1554_v39 = vld [vmem:[#allocation2 + $0x38] sm:$0xff]  ;;  %s1801_s4 = sld [smem:[#allocation32_spill]] }
 0x18c   :  { %386 = sst [smem:[#allocation21 + $0x3]] %s1288_s17  ;;  %v1556_v40 = vld [vmem:[#allocation2 + $0x40] sm:$0xff]  ;;  %v1558_v41 = vld [vmem:[#allocation2 + $0x48] sm:$0xff]  ;;  %v1560_v42 = vld [vmem:[#allocation2 + $0x50] sm:$0xff]  ;;  %s364_s21 = scalar_lea.hbm %s1784_s14, 12288 }
 0x18d   :  { %388 = sst [smem:[#allocation21 + $0x4]] %s1799_s2  ;;  %v1562_v43 = vld [vmem:[#allocation2 + $0x58] sm:$0xff]  ;;  %v1564_v44 = vld [vmem:[#allocation2 + $0x60] sm:$0xff]  ;;  %v1566_v45 = vld [vmem:[#allocation2 + $0x68] sm:$0xff]  ;;  %s1300_s1 = smov [#allocation20]  }
 0x18e   :  { %390 = sst [smem:[#allocation21 + $0x5]] %s1287_s16  ;;  %v1568_v46 = vld [vmem:[#allocation2 + $0x70] sm:$0xff]  ;;  %v1570_v47 = vld [vmem:[#allocation2 + $0x78] sm:$0xff]  ;;  %v1572_v48 = vld [vmem:[#allocation2 + $0x80] sm:$0xff]  ;;  %s1802_s23 = smov [#allocation3]  }
 0x18f   :  { %392 = sst [smem:[#allocation21 + $0x6]] %s1799_s2  ;;  %v1574_v49 = vld [vmem:[#allocation2 + $0x88] sm:$0xff]  ;;  %v1576_v50 = vld [vmem:[#allocation2 + $0x90] sm:$0xff]  ;;  %v1578_v51 = vld [vmem:[#allocation2 + $0x98] sm:$0xff] }
 0x190   :  { %394 = sst [smem:[#allocation21 + $0x7]] %s1288_s17  ;;  %v1580_v52 = vld [vmem:[#allocation2 + $0xa0] sm:$0xff]  ;;  %v1582_v53 = vld [vmem:[#allocation2 + $0xa8] sm:$0xff]  ;;  %v1584_v54 = vld [vmem:[#allocation2 + $0xb0] sm:$0xff] }
 0x191   :  { %396 = sst [smem:[#allocation21 + $0x8]] %s1800_s3  ;;  %v1586_v55 = vld [vmem:[#allocation2 + $0xb8] sm:$0xff]  ;;  %v1588_v58 = vld [vmem:[#allocation2 + $0xc0] sm:$0xff]  ;;  %v1590_v59 = vld [vmem:[#allocation2 + $0xc8] sm:$0xff]  ;;  %s1803_s24 = int_to_ptr.vmem [resolvable:$true] %s1801_s4 }
 0x192   :  { %v1592_v60 = vld [vmem:[#allocation2 + $0xd0] sm:$0xff]  ;;  %v1597_v61 = vld [vmem:[#allocation2 + $0xd8] sm:$0xff]  ;;  %v1599_v62 = vld [vmem:[#allocation2 + $0xe0] sm:$0xff] }
 0x193   :  { %v1601_v63 = vld [vmem:[#allocation2 + $0xe8] sm:$0xff]  ;;  %v1603_v0 = vld [vmem:[#allocation2 + $0xf0] sm:$0xff]  ;;  %v1605_v1 = vld [vmem:[#allocation2 + $0xf8] sm:$0xff] }
 0x194   :  { %398 = dma.general %s364_s21, 4096, %s1803_s24, %s1802_s23, %s1300_s1, [#allocation21], %s1423_s22, 0  }
 0x195   :  { %1273 = dma.done.wait [#allocation3 + $0x1], 4096 }
 0x196   :  { %1274 = vsyncadd [#allocation3 + $0x1], 4294963200  ;;  %467 = vmatprep.mubr.bf16.mxu0 %v286_v31  ;;  %585 = sst [smem:[#allocation23]] %s1284_s28  ;;  %v404_v2 = vld [vmem:[#allocation2 + $0x108] sm:$0xff]  ;;  %v403_v3 = vld [vmem:[#allocation2 + $0x100] sm:$0xff]  ;;  %s569_s20 = scalar_lea.hbm %s1784_s14, 16384 }
 0x197   :  { %587 = sst [smem:[#allocation23 + $0x1]] %s1284_s28  ;;  %v406_v4 = vld [vmem:[#allocation2 + $0x118] sm:$0xff]  ;;  %435 = vmatprep.subr.bf16.mxu0 %v404_v2  ;;  %v405_v5 = vld [vmem:[#allocation2 + $0x110] sm:$0xff]  ;;  %v408_v6 = vld [vmem:[#allocation2 + $0x128] sm:$0xff]  ;;  %s1301_s18 = smov [#allocation22]  }
 0x198   :  { %589 = sst [smem:[#allocation23 + $0x2]] %s1287_s16  ;;  %436 = vmatpush1.bf16.msra.mxu0 %v403_v3  ;;  %v407_v7 = vld [vmem:[#allocation2 + $0x120] sm:$0xff]  ;;  %v410_v8 = vld [vmem:[#allocation2 + $0x138] sm:$0xff]  ;;  %v409_v9 = vld [vmem:[#allocation2 + $0x130] sm:$0xff]  ;;  %s1805_s26 = smov [#allocation3 + $0x1]  }
 0x199   :  { %591 = sst [smem:[#allocation23 + $0x3]] %s1288_s17  ;;  %437 = vmatprep.subr.bf16.mxu0 %v406_v4  ;;  %v412_v10 = vld [vmem:[#allocation2 + $0x148] sm:$0xff]  ;;  %v411_v11 = vld [vmem:[#allocation2 + $0x140] sm:$0xff]  ;;  %v414_v15 = vld [vmem:[#allocation2 + $0x158] sm:$0xff] }
 0x19a   :  { %593 = sst [smem:[#allocation23 + $0x4]] %s1799_s2  ;;  %v413_v16 = vld [vmem:[#allocation2 + $0x150] sm:$0xff]  ;;  %v416_v17 = vld [vmem:[#allocation2 + $0x168] sm:$0xff]  ;;  %v415_v18 = vld [vmem:[#allocation2 + $0x160] sm:$0xff] }
 0x19b   :  { %595 = sst [smem:[#allocation23 + $0x5]] %s1287_s16  ;;  %v418_v19 = vld [vmem:[#allocation2 + $0x178] sm:$0xff]  ;;  %v417_v20 = vld [vmem:[#allocation2 + $0x170] sm:$0xff]  ;;  %v420_v21 = vld [vmem:[#allocation2 + $0x188] sm:$0xff]  ;;  %s1804_s16 = sld [smem:[#allocation33_spill]] }
 0x19c   :  { %597 = sst [smem:[#allocation23 + $0x6]] %s1799_s2  ;;  %438 = vmatpush1.bf16.msra.mxu0 %v405_v5  ;;  %v419_v22 = vld [vmem:[#allocation2 + $0x180] sm:$0xff]  ;;  %v422_v23 = vld [vmem:[#allocation2 + $0x198] sm:$0xff]  ;;  %v421_v27 = vld [vmem:[#allocation2 + $0x190] sm:$0xff] }
 0x19d   :  { %599 = sst [smem:[#allocation23 + $0x7]] %s1288_s17  ;;  %439 = vmatprep.subr.bf16.mxu0 %v408_v6  ;;  %v424_v31 = vld [vmem:[#allocation2 + $0x1a8] sm:$0xff]  ;;  %v423_v2 = vld [vmem:[#allocation2 + $0x1a0] sm:$0xff]  ;;  %v426_v3 = vld [vmem:[#allocation2 + $0x1b8] sm:$0xff] }
 0x19e   :  { %601 = sst [smem:[#allocation23 + $0x8]] %s1800_s3  ;;  %v425_v4 = vld [vmem:[#allocation2 + $0x1b0] sm:$0xff]  ;;  %v428_v5 = vld [vmem:[#allocation2 + $0x1c8] sm:$0xff]  ;;  %v427_v6 = vld [vmem:[#allocation2 + $0x1c0] sm:$0xff] }
 0x19f   :  { %v529_v13 = vld [vmem:[%s1776_s6] sm:$0x3] }
 0x1a0   :  { %440 = vmatpush1.bf16.msra.mxu0 %v407_v7  ;;  %v430_v7 = vld [vmem:[#allocation2 + $0x1d8] sm:$0xff]  ;;  %v534_v14 = vrot.slane %v529_v13, %v1494_v56  ;;  %v538_v25 = vrot.slane %v529_v13, %v1496_v57 }
 0x1a1   :  { %441 = vmatprep.subr.bf16.mxu0 %v410_v8  ;;  %v429_v8 = vld [vmem:[#allocation2 + $0x1d0] sm:$0xff]  ;;  %s1806_s27 = int_to_ptr.vmem [resolvable:$true] %s1804_s16 }
 0x1a4   :  { %442 = vmatpush1.bf16.msra.mxu0 %v409_v9  ;;  %v432_v9 = vld [vmem:[#allocation2 + $0x1e8] sm:$0xff] }
 0x1a5   :  { %443 = vmatprep.subr.bf16.mxu0 %v412_v10  ;;  %v431_v10 = vld [vmem:[#allocation2 + $0x1e0] sm:$0xff] }
 0x1a8   :  { %444 = vmatpush1.bf16.msra.mxu0 %v411_v11  ;;  %v434_v11 = vld [vmem:[#allocation2 + $0x1f8] sm:$0xff] }
 0x1a9   :  { %445 = vmatprep.subr.bf16.mxu0 %v414_v15  ;;  %v433_v15 = vld [vmem:[#allocation2 + $0x1f0] sm:$0xff] }
 0x1aa   :  { %603 = dma.general %s569_s20, 4096, %s1806_s27, %s1805_s26, %s1301_s18, [#allocation23], %s1423_s22, 0  }
 0x1ac   :  { %446 = vmatpush1.bf16.msra.mxu0 %v413_v16 }
 0x1ad   :  { %447 = vmatprep.subr.bf16.mxu0 %v416_v17 }
 0x1b0   :  { %448 = vmatpush1.bf16.msra.mxu0 %v415_v18 }
 0x1b1   :  { %449 = vmatprep.subr.bf16.mxu0 %v418_v19 }
 0x1b4   :  { %450 = vmatpush1.bf16.msra.mxu0 %v417_v20 }
 0x1b5   :  { %451 = vmatprep.subr.bf16.mxu0 %v420_v21 }
 0x1b8   :  { %452 = vmatpush1.bf16.msra.mxu0 %v419_v22 }
 0x1b9   :  { %453 = vmatprep.subr.bf16.mxu0 %v422_v23 }
 0x1bc   :  { %454 = vmatpush1.bf16.msra.mxu0 %v421_v27 }
 0x1bd   :  { %455 = vmatprep.subr.bf16.mxu0 %v424_v31 }
 0x1c0   :  { %456 = vmatpush1.bf16.msra.mxu0 %v423_v2 }
 0x1c1   :  { %457 = vmatprep.subr.bf16.mxu0 %v426_v3 }
 0x1c4   :  { %458 = vmatpush1.bf16.msra.mxu0 %v425_v4 }
 0x1c5   :  { %459 = vmatprep.subr.bf16.mxu0 %v428_v5 }
 0x1c8   :  { %460 = vmatpush1.bf16.msra.mxu0 %v427_v6 }
 0x1c9   :  { %461 = vmatprep.subr.bf16.mxu0 %v430_v7 }
 0x1cc   :  { %462 = vmatpush1.bf16.msra.mxu0 %v429_v8 }
 0x1cd   :  { %463 = vmatprep.subr.bf16.mxu0 %v432_v9 }
 0x1d0   :  { %464 = vmatpush1.bf16.msra.mxu0 %v431_v10 }
 0x1d1   :  { %465 = vmatprep.subr.bf16.mxu0 %v434_v11 }
 0x1d4   :  { %466 = vmatpush1.bf16.msra.mxu0 %v433_v15 }
 0x1d5   :  { %478 = vmatprep.subr.bf16.mxu0 %v1540_v33 }
 0x1d7   :  { %468 = vmatmul.mubr.bf16.vlgmr.msra.gmra.mrb[0].mxu0 %v285_v30 }
 0x1d8   :  { %479 = vmatpush1.bf16.msra.mxu0 %v1538_v32  ;;  %510 = vmatprep.mubr.bf16.mxu0 %v246_v29 }
 0x1d9   :  { %480 = vmatprep.subr.bf16.mxu0 %v1545_v35 }
 0x1dc   :  { %481 = vmatpush1.bf16.msra.mxu0 %v1542_v34 }
 0x1dd   :  { %482 = vmatprep.subr.bf16.mxu0 %v1549_v37 }
 0x1e0   :  { %483 = vmatpush1.bf16.msra.mxu0 %v1547_v36 }
 0x1e1   :  { %484 = vmatprep.subr.bf16.mxu0 %v1554_v39 }
 0x1e4   :  { %485 = vmatpush1.bf16.msra.mxu0 %v1552_v38 }
 0x1e5   :  { %486 = vmatprep.subr.bf16.mxu0 %v1558_v41 }
 0x1e8   :  { %487 = vmatpush1.bf16.msra.mxu0 %v1556_v40 }
 0x1e9   :  { %488 = vmatprep.subr.bf16.mxu0 %v1562_v43 }
 0x1ec   :  { %489 = vmatpush1.bf16.msra.mxu0 %v1560_v42 }
 0x1ed   :  { %490 = vmatprep.subr.bf16.mxu0 %v1566_v45 }
 0x1f0   :  { %491 = vmatpush1.bf16.msra.mxu0 %v1564_v44 }
 0x1f1   :  { %492 = vmatprep.subr.bf16.mxu0 %v1570_v47 }
 0x1f4   :  { %493 = vmatpush1.bf16.msra.mxu0 %v1568_v46 }
 0x1f5   :  { %494 = vmatprep.subr.bf16.mxu0 %v1574_v49 }
 0x1f8   :  { %495 = vmatpush1.bf16.msra.mxu0 %v1572_v48 }
 0x1f9   :  { %496 = vmatprep.subr.bf16.mxu0 %v1578_v51 }
 0x1fc   :  { %497 = vmatpush1.bf16.msra.mxu0 %v1576_v50 }
 0x1fd   :  { %498 = vmatprep.subr.bf16.mxu0 %v1582_v53 }
 0x200   :  { %499 = vmatpush1.bf16.msra.mxu0 %v1580_v52 }
 0x201   :  { %500 = vmatprep.subr.bf16.mxu0 %v1586_v55 }
 0x204   :  { %501 = vmatpush1.bf16.msra.mxu0 %v1584_v54 }
 0x205   :  { %502 = vmatprep.subr.bf16.mxu0 %v1590_v59 }
 0x208   :  { %503 = vmatpush1.bf16.msra.mxu0 %v1588_v58 }
 0x209   :  { %504 = vmatprep.subr.bf16.mxu0 %v1597_v61 }
 0x20c   :  { %505 = vmatpush1.bf16.msra.mxu0 %v1592_v60 }
 0x20d   :  { %506 = vmatprep.subr.bf16.mxu0 %v1601_v63 }
 0x210   :  { %507 = vmatpush1.bf16.msra.mxu0 %v1599_v62 }
 0x211   :  { %508 = vmatprep.subr.bf16.mxu0 %v1605_v1 }
 0x214   :  { %509 = vmatpush1.bf16.msra.mxu0 %v1603_v0 }
 0x217   :  { %511 = vmatmul.mubr.bf16.vlgmr.msra.gmra.mrb[0].mxu0 %v245_v28 }
 0x2ea   :  { %v512_v26 = vpop.f32.mrb[0].mxu0 }
 0x2eb   :  { %v541_v29 = vadd.f32 %v534_v14, %v512_v26  ;;  %v514_v12 = vpop.f32.mrb[1].mxu0 }
 0x2ec   :  { %v542_v24 = vadd.f32 %v538_v25, %v514_v12  ;;  %v516_v28 = vpop.f32.mrb[2].mxu0 }
 0x2ed   :  { %v549_v30 = vmul.f32 0.70710677, %v541_v29  ;;  %v543_v32 = vadd.f32 %v534_v14, %v516_v28  ;;  %v518_v33 = vpop.f32.mrb[3].mxu0  ;;  %v545_v44 = vmul.f32 0.5, %v541_v29 }
 0x2ee   :  { %v550_v34 = vmul.f32 0.70710677, %v542_v24  ;;  %v544_v35 = vadd.f32 %v538_v25, %v518_v33  ;;  %v546_v47 = vmul.f32 0.5, %v542_v24 }
 0x2ef   :  { %1177 = verf.f32 %v549_v30  ;;  %v551_v36 = vmul.f32 0.70710677, %v543_v32  ;;  %v547_v45 = vmul.f32 0.5, %v543_v32 }
 0x2f0   :  { %1179 = verf.f32 %v550_v34  ;;  %v552_v37 = vmul.f32 0.70710677, %v544_v35  ;;  %v548_v48 = vmul.f32 0.5, %v544_v35 }
 0x2f1   :  { %1181 = verf.f32 %v551_v36 }
 0x2f2   :  { %1183 = verf.f32 %v552_v37 }
 0x2f9   :  { %v1178_v38 = vpop.eup %1177 }
 0x2fa   :  { %v1180_v39 = vpop.eup %1179  ;;  %v557_v40 = vadd.f32 1.0, %v1178_v38 }
 0x2fb   :  { %v1182_v41 = vpop.eup %1181  ;;  %v558_v42 = vadd.f32 1.0, %v1180_v39 }
 0x2fc   :  { %v1184_v43 = vpop.eup %1183  ;;  %v559_v46 = vadd.f32 1.0, %v1182_v41  ;;  %v1673_v50 = vmul.f32 %v557_v40, %v545_v44 }
 0x2fd   :  { %v560_v49 = vadd.f32 1.0, %v1184_v43  ;;  %v562_v52 = vmul.f32 %v558_v42, %v546_v47 }
 0x2fe   :  { %v1675_v51 = vmul.f32 %v559_v46, %v547_v45 }
 0x2ff   :  { %v564_v53 = vmul.f32 %v560_v49, %v548_v48 }
 0x300   :  { %v565_v54 = vpack.c.bf16 %v1675_v51, %v1673_v50 }
 0x301   :  { %v566_v55 = vpack.c.bf16 %v564_v53, %v562_v52 }
 0x302   :  { %1275 = dma.done.wait [#allocation3 + $0x2], 4096 }
 0x303   :  { %1276 = vsyncadd [#allocation3 + $0x2], 4294963200  ;;  %672 = vmatprep.mubr.bf16.mxu1 %v566_v55  ;;  %v609_v58 = vld [vmem:[#allocation2 + $0x208] sm:$0xff]  ;;  %v608_v59 = vld [vmem:[#allocation2 + $0x200] sm:$0xff] }
 0x304   :  { %v611_v60 = vld [vmem:[#allocation2 + $0x218] sm:$0xff]  ;;  %640 = vmatprep.subr.bf16.mxu1 %v609_v58  ;;  %v610_v61 = vld [vmem:[#allocation2 + $0x210] sm:$0xff]  ;;  %v613_v62 = vld [vmem:[#allocation2 + $0x228] sm:$0xff] }
 0x305   :  { %641 = vmatpush1.bf16.msra.mxu1 %v608_v59  ;;  %v612_v63 = vld [vmem:[#allocation2 + $0x220] sm:$0xff]  ;;  %v615_v0 = vld [vmem:[#allocation2 + $0x238] sm:$0xff]  ;;  %v614_v1 = vld [vmem:[#allocation2 + $0x230] sm:$0xff] }
 0x306   :  { %642 = vmatprep.subr.bf16.mxu1 %v611_v60  ;;  %v617_v16 = vld [vmem:[#allocation2 + $0x248] sm:$0xff]  ;;  %v616_v17 = vld [vmem:[#allocation2 + $0x240] sm:$0xff]  ;;  %v619_v18 = vld [vmem:[#allocation2 + $0x258] sm:$0xff] }
 0x307   :  { %v618_v19 = vld [vmem:[#allocation2 + $0x250] sm:$0xff]  ;;  %v621_v20 = vld [vmem:[#allocation2 + $0x268] sm:$0xff]  ;;  %v620_v21 = vld [vmem:[#allocation2 + $0x260] sm:$0xff] }
 0x308   :  { %v623_v22 = vld [vmem:[#allocation2 + $0x278] sm:$0xff]  ;;  %v622_v23 = vld [vmem:[#allocation2 + $0x270] sm:$0xff]  ;;  %v625_v27 = vld [vmem:[#allocation2 + $0x288] sm:$0xff] }
 0x309   :  { %643 = vmatpush1.bf16.msra.mxu1 %v610_v61  ;;  %v624_v31 = vld [vmem:[#allocation2 + $0x280] sm:$0xff]  ;;  %v627_v2 = vld [vmem:[#allocation2 + $0x298] sm:$0xff]  ;;  %v626_v3 = vld [vmem:[#allocation2 + $0x290] sm:$0xff] }
 0x30a   :  { %644 = vmatprep.subr.bf16.mxu1 %v613_v62  ;;  %v629_v4 = vld [vmem:[#allocation2 + $0x2a8] sm:$0xff]  ;;  %v628_v5 = vld [vmem:[#allocation2 + $0x2a0] sm:$0xff]  ;;  %v631_v6 = vld [vmem:[#allocation2 + $0x2b8] sm:$0xff] }
 0x30b   :  { %v630_v7 = vld [vmem:[#allocation2 + $0x2b0] sm:$0xff]  ;;  %v633_v8 = vld [vmem:[#allocation2 + $0x2c8] sm:$0xff]  ;;  %v632_v9 = vld [vmem:[#allocation2 + $0x2c0] sm:$0xff] }
 0x30c   :  { %v635_v10 = vld [vmem:[#allocation2 + $0x2d8] sm:$0xff]  ;;  %v634_v11 = vld [vmem:[#allocation2 + $0x2d0] sm:$0xff]  ;;  %v637_v15 = vld [vmem:[#allocation2 + $0x2e8] sm:$0xff] }
 0x30d   :  { %645 = vmatpush1.bf16.msra.mxu1 %v612_v63  ;;  %v636_v13 = vld [vmem:[#allocation2 + $0x2e0] sm:$0xff]  ;;  %v639_v14 = vld [vmem:[#allocation2 + $0x2f8] sm:$0xff]  ;;  %v638_v25 = vld [vmem:[#allocation2 + $0x2f0] sm:$0xff] }
 0x30e   :  { %646 = vmatprep.subr.bf16.mxu1 %v615_v0  ;;  %v691_v26 = vld [vmem:[%s1777_s7] sm:$0x3]  ;;  %v708_v33 = vld [vmem:[#allocation8 + $0x8] sm:$0xff]  ;;  %v709_v37 = vld [vmem:[#allocation8 + $0x10] sm:$0xff] }
 0x30f   :  { %v696_v29 = vrot.slane %v691_v26, %v1494_v56  ;;  %v700_v12 = vrot.slane %v691_v26, %v1496_v57  ;;  %v707_v28 = vld [vmem:[#allocation8] sm:$0xff]  ;;  %v710_v39 = vld [vmem:[#allocation8 + $0x18] sm:$0xff] }
 0x311   :  { %647 = vmatpush1.bf16.msra.mxu1 %v614_v1 }
 0x312   :  { %648 = vmatprep.subr.bf16.mxu1 %v617_v16 }
 0x315   :  { %649 = vmatpush1.bf16.msra.mxu1 %v616_v17 }
 0x316   :  { %650 = vmatprep.subr.bf16.mxu1 %v619_v18 }
 0x319   :  { %651 = vmatpush1.bf16.msra.mxu1 %v618_v19  ;;  %v756_v19 = vld [vmem:[%s1778_s8] sm:$0x3] }
 0x31a   :  { %652 = vmatprep.subr.bf16.mxu1 %v621_v20 }
 0x31d   :  { %653 = vmatpush1.bf16.msra.mxu1 %v620_v21  ;;  %v761_v21 = vrot.slane %v756_v19, %v1494_v56 }
 0x31e   :  { %654 = vmatprep.subr.bf16.mxu1 %v623_v22  ;;  %v765_v22 = vrot.slane %v756_v19, %v1496_v57 }
 0x321   :  { %655 = vmatpush1.bf16.msra.mxu1 %v622_v23  ;;  %v772_v23 = vld [vmem:[%s1779_s9] sm:$0x3] }
 0x322   :  { %656 = vmatprep.subr.bf16.mxu1 %v625_v27 }
 0x325   :  { %657 = vmatpush1.bf16.msra.mxu1 %v624_v31 }
 0x326   :  { %658 = vmatprep.subr.bf16.mxu1 %v627_v2 }
 0x329   :  { %659 = vmatpush1.bf16.msra.mxu1 %v626_v3  ;;  %v777_v3 = vrot.slane %v772_v23, %v1494_v56 }
 0x32a   :  { %660 = vmatprep.subr.bf16.mxu1 %v629_v4  ;;  %v781_v4 = vrot.slane %v772_v23, %v1496_v57 }
 0x32d   :  { %661 = vmatpush1.bf16.msra.mxu1 %v628_v5 }
 0x32e   :  { %662 = vmatprep.subr.bf16.mxu1 %v631_v6 }
 0x331   :  { %663 = vmatpush1.bf16.msra.mxu1 %v630_v7 }
 0x332   :  { %664 = vmatprep.subr.bf16.mxu1 %v633_v8 }
 0x335   :  { %665 = vmatpush1.bf16.msra.mxu1 %v632_v9 }
 0x336   :  { %666 = vmatprep.subr.bf16.mxu1 %v635_v10 }
 0x339   :  { %667 = vmatpush1.bf16.msra.mxu1 %v634_v11 }
 0x33a   :  { %668 = vmatprep.subr.bf16.mxu1 %v637_v15 }
 0x33d   :  { %669 = vmatpush1.bf16.msra.mxu1 %v636_v13 }
 0x33e   :  { %670 = vmatprep.subr.bf16.mxu1 %v639_v14 }
 0x341   :  { %671 = vmatpush1.bf16.msra.mxu1 %v638_v25 }
 0x344   :  { %673 = vmatmul.mubr.bf16.vlgmr.msra.gmra.mrb[0].mxu1 %v565_v54 }
 0x417   :  { %v674_v24 = vpop.f32.mrb[0].mxu1 }
 0x418   :  { %v703_v30 = vadd.f32 %v696_v29, %v674_v24  ;;  %v676_v32 = vpop.f32.mrb[1].mxu1 }
 0x419   :  { %v704_v34 = vadd.f32 %v700_v12, %v676_v32  ;;  %v678_v35 = vpop.f32.mrb[2].mxu1 }
 0x41a   :  { %v705_v36 = vadd.f32 %v696_v29, %v678_v35  ;;  %v680_v38 = vpop.f32.mrb[3].mxu1  ;;  %v1687_v40 = vadd.f32 %v707_v28, %v703_v30 }
 0x41b   :  { %v706_v41 = vadd.f32 %v700_v12, %v680_v38  ;;  %v1689_v42 = vadd.f32 %v708_v33, %v704_v34 }
 0x41c   :  { %v1691_v43 = vadd.f32 %v709_v37, %v705_v36 }
 0x41d   :  { %v1693_v44 = vadd.f32 %v710_v39, %v706_v41  ;;  %v723_v45 = vadd.f32 %v1689_v42, %v1687_v40 }
 0x41f   :  { %724 = vadd.xlane.f32.xlu0 %v723_v45  ;;  %v726_v46 = vadd.f32 %v1693_v44, %v1691_v43 }
 0x423   :  { %727 = vadd.xlane.f32.xlu0 %v726_v46 }
 0x4ac   :  { %v725_v47 = vpop.xlane.xlu0 %724 }
 0x4ad   :  { %v730_v48 = vmul.f32 0.00390625, %v725_v47 }
 0x4af   :  { %v732_v49 = vsub.f32 %v1687_v40, %v730_v48  ;;  %v733_v50 = vsub.f32 %v1689_v42, %v730_v48 }
 0x4b0   :  { %v728_v51 = vpop.xlane.xlu0 %727 }
 0x4b1   :  { %v731_v52 = vmul.f32 0.00390625, %v728_v51  ;;  %v736_v53 = vmul.f32 %v732_v49, %v732_v49  ;;  %v737_v54 = vmul.f32 %v733_v50, %v733_v50 }
 0x4b3   :  { %v734_v55 = vsub.f32 %v1691_v43, %v731_v52  ;;  %v735_v58 = vsub.f32 %v1693_v44, %v731_v52  ;;  %v740_v59 = vadd.f32 %v737_v54, %v736_v53 }
 0x4b5   :  { %741 = vadd.xlane.f32.xlu1 %v740_v59  ;;  %v738_v60 = vmul.f32 %v734_v55, %v734_v55  ;;  %v739_v61 = vmul.f32 %v735_v58, %v735_v58 }
 0x4b7   :  { %v743_v62 = vadd.f32 %v739_v61, %v738_v60 }
 0x4b9   :  { %744 = vadd.xlane.f32.xlu1 %v743_v62 }
 0x542   :  { %v742_v63 = vpop.xlane.xlu1 %741 }
 0x543   :  { %v746_v0 = vmul.f32 0.00390625, %v742_v63 }
 0x545   :  { %v748_v1 = vadd.f32 1e-05, %v746_v0 }
 0x546   :  { %v745_v16 = vpop.xlane.xlu1 %744 }
 0x547   :  { %1185 = vrsqrt.f32 %v748_v1  ;;  %v747_v17 = vmul.f32 0.00390625, %v745_v16 }
 0x549   :  { %v749_v18 = vadd.f32 1e-05, %v747_v17 }
 0x54b   :  { %1187 = vrsqrt.f32 %v749_v18 }
 0x551   :  { %v1186_v20 = vpop.eup %1185 }
 0x552   :  { %v752_v27 = vmul.f32 %v1186_v20, %v732_v49  ;;  %v753_v31 = vmul.f32 %v1186_v20, %v733_v50 }
 0x554   :  { %v768_v5 = vmul.f32 %v761_v21, %v752_v27  ;;  %v769_v6 = vmul.f32 %v765_v22, %v753_v31 }
 0x555   :  { %v1188_v2 = vpop.eup %1187 }
 0x556   :  { %v754_v7 = vmul.f32 %v1188_v2, %v734_v55  ;;  %v755_v8 = vmul.f32 %v1188_v2, %v735_v58  ;;  %v1713_v11 = vadd.f32 %v777_v3, %v768_v5  ;;  %v785_v15 = vadd.f32 %v781_v4, %v769_v6 }
 0x558   :  { %v770_v9 = vmul.f32 %v761_v21, %v754_v7  ;;  %v771_v10 = vmul.f32 %v765_v22, %v755_v8 }
 0x55a   :  { %v1715_v13 = vadd.f32 %v777_v3, %v770_v9  ;;  %v787_v14 = vadd.f32 %v781_v4, %v771_v10 }
 0x55c   :  { %v788_v25 = vpack.c.bf16 %v1715_v13, %v1713_v11  ;;  %v789_v26 = vpack.c.bf16 %v787_v14, %v785_v15 }
 0x55d   :  { %1277 = dma.done.wait [#allocation3], 4096 }
 0x55e   :  { %1278 = vsyncadd [#allocation3], 4294963200  ;;  %860 = vmatprep.mubr.bf16.mxu1 %v789_v26  ;;  %v797_v29 = vld [vmem:[#allocation2 + $0x8] sm:$0xff]  ;;  %v796_v12 = vld [vmem:[#allocation2] sm:$0xff] }
 0x55f   :  { %v799_v24 = vld [vmem:[#allocation2 + $0x18] sm:$0xff]  ;;  %828 = vmatprep.subr.bf16.mxu1 %v797_v29  ;;  %v798_v28 = vld [vmem:[#allocation2 + $0x10] sm:$0xff]  ;;  %v801_v30 = vld [vmem:[#allocation2 + $0x28] sm:$0xff] }
 0x560   :  { %829 = vmatpush1.bf16.msra.mxu1 %v796_v12  ;;  %v800_v32 = vld [vmem:[#allocation2 + $0x20] sm:$0xff]  ;;  %v803_v33 = vld [vmem:[#allocation2 + $0x38] sm:$0xff]  ;;  %v802_v34 = vld [vmem:[#allocation2 + $0x30] sm:$0xff] }
 0x561   :  { %830 = vmatprep.subr.bf16.mxu1 %v799_v24  ;;  %v805_v35 = vld [vmem:[#allocation2 + $0x48] sm:$0xff]  ;;  %v804_v36 = vld [vmem:[#allocation2 + $0x40] sm:$0xff]  ;;  %v807_v37 = vld [vmem:[#allocation2 + $0x58] sm:$0xff] }
 0x562   :  { %v806_v38 = vld [vmem:[#allocation2 + $0x50] sm:$0xff]  ;;  %v809_v39 = vld [vmem:[#allocation2 + $0x68] sm:$0xff]  ;;  %v808_v41 = vld [vmem:[#allocation2 + $0x60] sm:$0xff] }
 0x563   :  { %v811_v45 = vld [vmem:[#allocation2 + $0x78] sm:$0xff]  ;;  %v810_v46 = vld [vmem:[#allocation2 + $0x70] sm:$0xff]  ;;  %v813_v47 = vld [vmem:[#allocation2 + $0x88] sm:$0xff] }
 0x564   :  { %831 = vmatpush1.bf16.msra.mxu1 %v798_v28  ;;  %v812_v48 = vld [vmem:[#allocation2 + $0x80] sm:$0xff]  ;;  %v815_v49 = vld [vmem:[#allocation2 + $0x98] sm:$0xff]  ;;  %v814_v50 = vld [vmem:[#allocation2 + $0x90] sm:$0xff] }
 0x565   :  { %832 = vmatprep.subr.bf16.mxu1 %v801_v30  ;;  %v817_v51 = vld [vmem:[#allocation2 + $0xa8] sm:$0xff]  ;;  %v816_v52 = vld [vmem:[#allocation2 + $0xa0] sm:$0xff]  ;;  %v819_v53 = vld [vmem:[#allocation2 + $0xb8] sm:$0xff] }
 0x566   :  { %v818_v54 = vld [vmem:[#allocation2 + $0xb0] sm:$0xff]  ;;  %v821_v55 = vld [vmem:[#allocation2 + $0xc8] sm:$0xff]  ;;  %v820_v58 = vld [vmem:[#allocation2 + $0xc0] sm:$0xff] }
 0x567   :  { %v823_v59 = vld [vmem:[#allocation2 + $0xd8] sm:$0xff]  ;;  %v822_v60 = vld [vmem:[#allocation2 + $0xd0] sm:$0xff]  ;;  %v825_v61 = vld [vmem:[#allocation2 + $0xe8] sm:$0xff] }
 0x568   :  { %833 = vmatpush1.bf16.msra.mxu1 %v800_v32  ;;  %v824_v62 = vld [vmem:[#allocation2 + $0xe0] sm:$0xff]  ;;  %v827_v63 = vld [vmem:[#allocation2 + $0xf8] sm:$0xff]  ;;  %v826_v0 = vld [vmem:[#allocation2 + $0xf0] sm:$0xff] }
 0x569   :  { %834 = vmatprep.subr.bf16.mxu1 %v803_v33  ;;  %v879_v1 = vld [vmem:[%s1780_s10] sm:$0x3] }
 0x56a   :  { %v884_v16 = vrot.slane %v879_v1, %v1494_v56  ;;  %v888_v17 = vrot.slane %v879_v1, %v1496_v57 }
 0x56c   :  { %835 = vmatpush1.bf16.msra.mxu1 %v802_v34 }
 0x56d   :  { %836 = vmatprep.subr.bf16.mxu1 %v805_v35 }
 0x570   :  { %837 = vmatpush1.bf16.msra.mxu1 %v804_v36 }
 0x571   :  { %838 = vmatprep.subr.bf16.mxu1 %v807_v37 }
 0x574   :  { %839 = vmatpush1.bf16.msra.mxu1 %v806_v38 }
 0x575   :  { %840 = vmatprep.subr.bf16.mxu1 %v809_v39 }
 0x578   :  { %841 = vmatpush1.bf16.msra.mxu1 %v808_v41 }
 0x579   :  { %842 = vmatprep.subr.bf16.mxu1 %v811_v45 }
 0x57c   :  { %843 = vmatpush1.bf16.msra.mxu1 %v810_v46 }
 0x57d   :  { %844 = vmatprep.subr.bf16.mxu1 %v813_v47 }
 0x580   :  { %845 = vmatpush1.bf16.msra.mxu1 %v812_v48 }
 0x581   :  { %846 = vmatprep.subr.bf16.mxu1 %v815_v49 }
 0x584   :  { %847 = vmatpush1.bf16.msra.mxu1 %v814_v50 }
 0x585   :  { %848 = vmatprep.subr.bf16.mxu1 %v817_v51 }
 0x588   :  { %849 = vmatpush1.bf16.msra.mxu1 %v816_v52 }
 0x589   :  { %850 = vmatprep.subr.bf16.mxu1 %v819_v53 }
 0x58c   :  { %851 = vmatpush1.bf16.msra.mxu1 %v818_v54 }
 0x58d   :  { %852 = vmatprep.subr.bf16.mxu1 %v821_v55 }
 0x590   :  { %853 = vmatpush1.bf16.msra.mxu1 %v820_v58 }
 0x591   :  { %854 = vmatprep.subr.bf16.mxu1 %v823_v59 }
 0x594   :  { %855 = vmatpush1.bf16.msra.mxu1 %v822_v60 }
 0x595   :  { %856 = vmatprep.subr.bf16.mxu1 %v825_v61 }
 0x598   :  { %857 = vmatpush1.bf16.msra.mxu1 %v824_v62 }
 0x599   :  { %858 = vmatprep.subr.bf16.mxu1 %v827_v63 }
 0x59c   :  { %859 = vmatpush1.bf16.msra.mxu1 %v826_v0 }
 0x59f   :  { %861 = vmatmul.mubr.bf16.vlgmr.msra.gmra.mrb[4].mxu1 %v788_v25 }
 0x672   :  { %v862_v18 = vpop.f32.mrb[4].mxu1 }
 0x673   :  { %v891_v19 = vadd.f32 %v884_v16, %v862_v18  ;;  %v864_v20 = vpop.f32.mrb[5].mxu1 }
 0x674   :  { %v892_v21 = vadd.f32 %v888_v17, %v864_v20  ;;  %v866_v22 = vpop.f32.mrb[6].mxu1 }
 0x675   :  { %v899_v23 = vmul.f32 0.70710677, %v891_v19  ;;  %v893_v27 = vadd.f32 %v884_v16, %v866_v22  ;;  %v868_v31 = vpop.f32.mrb[7].mxu1  ;;  %v895_v15 = vmul.f32 0.5, %v891_v19 }
 0x676   :  { %v900_v2 = vmul.f32 0.70710677, %v892_v21  ;;  %v894_v3 = vadd.f32 %v888_v17, %v868_v31  ;;  %v896_v25 = vmul.f32 0.5, %v892_v21 }
 0x677   :  { %1189 = verf.f32 %v899_v23  ;;  %v901_v4 = vmul.f32 0.70710677, %v893_v27  ;;  %v897_v13 = vmul.f32 0.5, %v893_v27 }
 0x678   :  { %1191 = verf.f32 %v900_v2  ;;  %v902_v5 = vmul.f32 0.70710677, %v894_v3  ;;  %v898_v26 = vmul.f32 0.5, %v894_v3 }
 0x679   :  { %1193 = verf.f32 %v901_v4 }
 0x67a   :  { %1195 = verf.f32 %v902_v5 }
 0x681   :  { %v1190_v6 = vpop.eup %1189 }
 0x682   :  { %v1192_v7 = vpop.eup %1191  ;;  %v907_v8 = vadd.f32 1.0, %v1190_v6 }
 0x683   :  { %v1194_v9 = vpop.eup %1193  ;;  %v908_v10 = vadd.f32 1.0, %v1192_v7 }
 0x684   :  { %v1196_v11 = vpop.eup %1195  ;;  %v909_v14 = vadd.f32 1.0, %v1194_v9  ;;  %v1727_v12 = vmul.f32 %v907_v8, %v895_v15 }
 0x685   :  { %v910_v29 = vadd.f32 1.0, %v1196_v11  ;;  %v912_v28 = vmul.f32 %v908_v10, %v896_v25 }
 0x686   :  { %v1729_v24 = vmul.f32 %v909_v14, %v897_v13 }
 0x687   :  { %v914_v30 = vmul.f32 %v910_v29, %v898_v26 }
 0x688   :  { %v915_v32 = vpack.c.bf16 %v1729_v24, %v1727_v12 }
 0x689   :  { %v916_v33 = vpack.c.bf16 %v914_v30, %v912_v28 }
 0x68a   :  { %1279 = dma.done.wait [#allocation3 + $0x1], 4096 }
 0x68b   :  { %1280 = vsyncadd [#allocation3 + $0x1], 4294963200  ;;  %987 = vmatprep.mubr.bf16.mxu0 %v916_v33  ;;  %v924_v34 = vld [vmem:[#allocation2 + $0x108] sm:$0xff]  ;;  %v923_v35 = vld [vmem:[#allocation2 + $0x100] sm:$0xff] }
 0x68c   :  { %v926_v36 = vld [vmem:[#allocation2 + $0x118] sm:$0xff]  ;;  %955 = vmatprep.subr.bf16.mxu0 %v924_v34  ;;  %v925_v37 = vld [vmem:[#allocation2 + $0x110] sm:$0xff]  ;;  %v928_v38 = vld [vmem:[#allocation2 + $0x128] sm:$0xff] }
 0x68d   :  { %956 = vmatpush1.bf16.msra.mxu0 %v923_v35  ;;  %v927_v39 = vld [vmem:[#allocation2 + $0x120] sm:$0xff]  ;;  %v930_v41 = vld [vmem:[#allocation2 + $0x138] sm:$0xff]  ;;  %v929_v45 = vld [vmem:[#allocation2 + $0x130] sm:$0xff] }
 0x68e   :  { %957 = vmatprep.subr.bf16.mxu0 %v926_v36  ;;  %v932_v46 = vld [vmem:[#allocation2 + $0x148] sm:$0xff]  ;;  %v931_v47 = vld [vmem:[#allocation2 + $0x140] sm:$0xff]  ;;  %v934_v48 = vld [vmem:[#allocation2 + $0x158] sm:$0xff] }
 0x68f   :  { %v933_v49 = vld [vmem:[#allocation2 + $0x150] sm:$0xff]  ;;  %v936_v50 = vld [vmem:[#allocation2 + $0x168] sm:$0xff]  ;;  %v935_v51 = vld [vmem:[#allocation2 + $0x160] sm:$0xff] }
 0x690   :  { %v938_v52 = vld [vmem:[#allocation2 + $0x178] sm:$0xff]  ;;  %v937_v53 = vld [vmem:[#allocation2 + $0x170] sm:$0xff]  ;;  %v940_v54 = vld [vmem:[#allocation2 + $0x188] sm:$0xff] }
 0x691   :  { %958 = vmatpush1.bf16.msra.mxu0 %v925_v37  ;;  %v939_v55 = vld [vmem:[#allocation2 + $0x180] sm:$0xff]  ;;  %v942_v58 = vld [vmem:[#allocation2 + $0x198] sm:$0xff]  ;;  %v941_v59 = vld [vmem:[#allocation2 + $0x190] sm:$0xff] }
 0x692   :  { %959 = vmatprep.subr.bf16.mxu0 %v928_v38  ;;  %v944_v60 = vld [vmem:[#allocation2 + $0x1a8] sm:$0xff]  ;;  %v943_v61 = vld [vmem:[#allocation2 + $0x1a0] sm:$0xff]  ;;  %v946_v62 = vld [vmem:[#allocation2 + $0x1b8] sm:$0xff] }
 0x693   :  { %v945_v63 = vld [vmem:[#allocation2 + $0x1b0] sm:$0xff]  ;;  %v948_v0 = vld [vmem:[#allocation2 + $0x1c8] sm:$0xff]  ;;  %v947_v1 = vld [vmem:[#allocation2 + $0x1c0] sm:$0xff] }
 0x694   :  { %v950_v16 = vld [vmem:[#allocation2 + $0x1d8] sm:$0xff]  ;;  %v949_v17 = vld [vmem:[#allocation2 + $0x1d0] sm:$0xff]  ;;  %v952_v18 = vld [vmem:[#allocation2 + $0x1e8] sm:$0xff] }
 0x695   :  { %960 = vmatpush1.bf16.msra.mxu0 %v927_v39  ;;  %v951_v19 = vld [vmem:[#allocation2 + $0x1e0] sm:$0xff]  ;;  %v954_v20 = vld [vmem:[#allocation2 + $0x1f8] sm:$0xff]  ;;  %v953_v21 = vld [vmem:[#allocation2 + $0x1f0] sm:$0xff] }
 0x696   :  { %961 = vmatprep.subr.bf16.mxu0 %v930_v41  ;;  %v1006_v22 = vld [vmem:[%s1781_s11] sm:$0x3] }
 0x697   :  { %v1011_v23 = vrot.slane %v1006_v22, %v1494_v56  ;;  %v1015_v27 = vrot.slane %v1006_v22, %v1496_v57 }
 0x699   :  { %962 = vmatpush1.bf16.msra.mxu0 %v929_v45  ;;  %v1062_v45 = vld [vmem:[%s1782_s12] sm:$0x3]  ;;  %s1302_s12 = smov [#allocation13]  }
 0x69a   :  { %963 = vmatprep.subr.bf16.mxu0 %v932_v46  ;;  %v1078_v46 = vld [vmem:[%s1783_s13] sm:$0x3]  ;;  %s1103_s13 = sshll.u32 %s1302_s12, 4  ;;  %s1104_s13 = int_to_ptr.vmem [resolvable:$true] %s1103_s13 }
 0x69b   :  { %s1245_s21 = scalar_lea.vmem %s1104_s13, 512  ;;  %p1250_p3 = scmp.lt.s32.totalorder %s1104_s13, %s1104_s13 }
 0x69c   :  { %p1246_p2 = scmp.ne.s32.totalorder %s1104_s13, %s1245_s21  ;;  %p1251_p4 = scmp.lt.s32.totalorder %s1245_s21, %s1245_s21 }
 0x69d   :  { %964 = vmatpush1.bf16.msra.mxu0 %v931_v47  ;;  %v1067_v47 = vrot.slane %v1062_v45, %v1494_v56 }
 0x69e   :  { %965 = vmatprep.subr.bf16.mxu0 %v934_v48  ;;  %v1071_v48 = vrot.slane %v1062_v45, %v1496_v57  ;;  %p1252_p5 = por %p1251_p4, %p1250_p3 }
 0x6a0   :  { %p1253_p6 = pnand %p1252_p5, %p1246_p2 }
 0x6a1   :  { %966 = vmatpush1.bf16.msra.mxu0 %v933_v49 }
 0x6a2   :  { %967 = vmatprep.subr.bf16.mxu0 %v936_v50 }
 0x6a5   :  { %968 = vmatpush1.bf16.msra.mxu0 %v935_v51 }
 0x6a6   :  { %969 = vmatprep.subr.bf16.mxu0 %v938_v52  ;;  %v1083_v52 = vrot.slane %v1078_v46, %v1494_v56 }
 0x6a9   :  { %970 = vmatpush1.bf16.msra.mxu0 %v937_v53  ;;  %v1087_v53 = vrot.slane %v1078_v46, %v1496_v57 }
 0x6aa   :  { %971 = vmatprep.subr.bf16.mxu0 %v940_v54 }
 0x6ad   :  { %972 = vmatpush1.bf16.msra.mxu0 %v939_v55 }
 0x6ae   :  { %973 = vmatprep.subr.bf16.mxu0 %v942_v58 }
 0x6b1   :  { %974 = vmatpush1.bf16.msra.mxu0 %v941_v59 }
 0x6b2   :  { %975 = vmatprep.subr.bf16.mxu0 %v944_v60 }
 0x6b5   :  { %976 = vmatpush1.bf16.msra.mxu0 %v943_v61 }
 0x6b6   :  { %977 = vmatprep.subr.bf16.mxu0 %v946_v62 }
 0x6b9   :  { %978 = vmatpush1.bf16.msra.mxu0 %v945_v63 }
 0x6ba   :  { %979 = vmatprep.subr.bf16.mxu0 %v948_v0 }
 0x6bd   :  { %980 = vmatpush1.bf16.msra.mxu0 %v947_v1 }
 0x6be   :  { %981 = vmatprep.subr.bf16.mxu0 %v950_v16 }
 0x6c1   :  { %982 = vmatpush1.bf16.msra.mxu0 %v949_v17 }
 0x6c2   :  { %983 = vmatprep.subr.bf16.mxu0 %v952_v18 }
 0x6c5   :  { %984 = vmatpush1.bf16.msra.mxu0 %v951_v19 }
 0x6c6   :  { %985 = vmatprep.subr.bf16.mxu0 %v954_v20 }
 0x6c9   :  { %986 = vmatpush1.bf16.msra.mxu0 %v953_v21 }
 0x6cc   :  { %988 = vmatmul.mubr.bf16.vlgmr.msra.gmra.mrb[4].mxu0 %v915_v32 }
 0x79f   :  { %v989_v31 = vpop.f32.mrb[4].mxu0 }
 0x7a0   :  { %v1018_v2 = vadd.f32 %v1011_v23, %v989_v31  ;;  %v991_v3 = vpop.f32.mrb[5].mxu0 }
 0x7a1   :  { %v1019_v4 = vadd.f32 %v1015_v27, %v991_v3  ;;  %v993_v5 = vpop.f32.mrb[6].mxu0 }
 0x7a2   :  { %v1026_v6 = vadd.f32 %v1018_v2, %v1687_v40  ;;  %v1020_v7 = vadd.f32 %v1011_v23, %v993_v5  ;;  %v995_v8 = vpop.f32.mrb[7].mxu0 }
 0x7a3   :  { %v1027_v9 = vadd.f32 %v1019_v4, %v1689_v42  ;;  %v1021_v10 = vadd.f32 %v1015_v27, %v995_v8 }
 0x7a4   :  { %v1028_v11 = vadd.f32 %v1020_v7, %v1691_v43 }
 0x7a5   :  { %v1029_v15 = vadd.f32 %v1021_v10, %v1693_v44  ;;  %v1030_v13 = vadd.f32 %v1027_v9, %v1026_v6 }
 0x7a7   :  { %1031 = vadd.xlane.f32.xlu0 %v1030_v13  ;;  %v1033_v14 = vadd.f32 %v1029_v15, %v1028_v11 }
 0x7ab   :  { %1034 = vadd.xlane.f32.xlu0 %v1033_v14 }
 0x834   :  { %v1032_v25 = vpop.xlane.xlu0 %1031 }
 0x835   :  { %v1036_v26 = vmul.f32 0.00390625, %v1032_v25 }
 0x837   :  { %v1038_v29 = vsub.f32 %v1026_v6, %v1036_v26  ;;  %v1039_v12 = vsub.f32 %v1027_v9, %v1036_v26 }
 0x838   :  { %v1035_v24 = vpop.xlane.xlu0 %1034 }
 0x839   :  { %v1037_v28 = vmul.f32 0.00390625, %v1035_v24  ;;  %v1042_v40 = vmul.f32 %v1038_v29, %v1038_v29  ;;  %v1043_v30 = vmul.f32 %v1039_v12, %v1039_v12 }
 0x83b   :  { %v1040_v32 = vsub.f32 %v1028_v11, %v1037_v28  ;;  %v1041_v33 = vsub.f32 %v1029_v15, %v1037_v28  ;;  %v1046_v42 = vadd.f32 %v1043_v30, %v1042_v40 }
 0x83d   :  { %1047 = vadd.xlane.f32.xlu1 %v1046_v42  ;;  %v1044_v34 = vmul.f32 %v1040_v32, %v1040_v32  ;;  %v1045_v43 = vmul.f32 %v1041_v33, %v1041_v33 }
 0x83f   :  { %v1049_v35 = vadd.f32 %v1045_v43, %v1044_v34 }
 0x841   :  { %1050 = vadd.xlane.f32.xlu1 %v1049_v35 }
 0x8ca   :  { %v1048_v44 = vpop.xlane.xlu1 %1047 }
 0x8cb   :  { %v1052_v36 = vmul.f32 0.00390625, %v1048_v44 }
 0x8cd   :  { %v1054_v37 = vadd.f32 1e-05, %v1052_v36 }
 0x8ce   :  { %v1051_v38 = vpop.xlane.xlu1 %1050 }
 0x8cf   :  { %1197 = vrsqrt.f32 %v1054_v37  ;;  %v1053_v39 = vmul.f32 0.00390625, %v1051_v38 }
 0x8d1   :  { %v1055_v41 = vadd.f32 1e-05, %v1053_v39 }
 0x8d3   :  { %1199 = vrsqrt.f32 %v1055_v41 }
 0x8d9   :  { %v1198_v49 = vpop.eup %1197 }
 0x8da   :  { %v1058_v50 = vmul.f32 %v1198_v49, %v1038_v29  ;;  %v1059_v51 = vmul.f32 %v1198_v49, %v1039_v12 }
 0x8dc   :  { %v1074_v54 = vmul.f32 %v1067_v47, %v1058_v50  ;;  %v1075_v55 = vmul.f32 %v1071_v48, %v1059_v51 }
 0x8dd   :  { %v1200_v58 = vpop.eup %1199 }
 0x8de   :  { %v1060_v59 = vmul.f32 %v1200_v58, %v1040_v32  ;;  %v1061_v60 = vmul.f32 %v1200_v58, %v1041_v33  ;;  %v1090_v61 = vadd.f32 %v1083_v52, %v1074_v54  ;;  %v1091_v62 = vadd.f32 %v1087_v53, %v1075_v55 }
 0x8e0   :  { %v1076_v63 = vmul.f32 %v1067_v47, %v1060_v59  ;;  %v1077_v0 = vmul.f32 %v1071_v48, %v1061_v60  ;;  %1094 = vst [vmem:[#allocation13] sm:$0xff] %v1090_v61  ;;  %1095 = vst [vmem:[#allocation13 + $0x8] sm:$0xff] %v1091_v62 }
 0x8e2   :  { %v1092_v1 = vadd.f32 %v1083_v52, %v1076_v63  ;;  %v1093_v16 = vadd.f32 %v1087_v53, %v1077_v0 }
 0x8e4   :  { %1096 = vst [vmem:[#allocation13 + $0x10] sm:$0xff] %v1092_v1  ;;  %1097 = vst [vmem:[#allocation13 + $0x18] sm:$0xff] %v1093_v16 }
 0x8e5   :  { %1256 = shalt.err (!%p1253_p6)
}
 0x8e6   :  { %s1257_s24 = scalar_lea.hbm %s1785_s15, 512 }
 0x8e7   :  { %p1258_p7 = scmp.ne.s32.totalorder %s1785_s15, %s1257_s24  ;;  %p1261_p8 = scmp.lt.u32.totalorder %s1257_s24, %s1785_s15 }
 0x8e9   :  { %p1263_p9 = pnand %p1261_p8, %p1258_p7 }
 0x8eb   :  { %1266 = shalt.err (!%p1263_p9)
}
 0x8ec   :  { %s1807_s0 = smov 16  }
 0x8ed   :  { %1109 = dma.vmem_to_hbm [thread:$0]  %s1104_s13, 512, %s1785_s15, [#allocation10], %s1284_s28, %s1284_s28, %s1807_s0  }
 0x8ee   :  { %1281 = dma.done.wait [#allocation10], 512  }
 0x8ef   :  { %1282 = vsyncadd [#allocation10], 4294966784 }
 0x8f0   :  { %1113 = vsyncpa [#allocation9], 1 }
 0x8f1   :  { %1114 = vsyncpa [#allocation12], 1 }
 0x8f2   :  { %1115 = vsyncpa [#allocation10], 1 }
 0x8f3   :  { %1116 = vsyncmov [#allocation3] }
 0x8f6   :  { %s1117_s26 = vpop.sfrf %1116 }
 0x8f7   :  { %p1146_p10 = scmp.ne.s32.totalorder %s1117_s26, 0 }
 0x8f9   :  { %1121 = shalt.err (%p1146_p10)  }
 0x8fa   :  { %1123 = vsyncmov [#allocation3 + $0x1] }
 0x8fd   :  { %s1124_s27 = vpop.sfrf %1123 }
 0x8fe   :  { %p1147_p11 = scmp.ne.s32.totalorder %s1124_s27, 0 }
 0x900   :  { %1128 = shalt.err (%p1147_p11)  }
 0x901   :  { %1130 = vsyncmov [#allocation3 + $0x2] }
 0x904   :  { %s1131_s6 = vpop.sfrf %1130 }
 0x905   :  { %p1148_p12 = scmp.ne.s32.totalorder %s1131_s6, 0 }
 0x907   :  { %1135 = shalt.err (%p1148_p12)  }

</bundles_post_ra>
